<compile_context>
chip_gen: v5e
topology: v5e:2x2
jax: 0.10.0
libtpu: 0.0.40
codegen_flags: <defaults>
</compile_context>

<pallas_src>
import functools

import jax
import jax.numpy as jnp
from jax.experimental import pallas as pl
from jax.experimental.pallas import tpu as pltpu

NUM_CLASSES = 2
LAYER_DIMS = [120, 128, 256, 512, 256, 128, 64, NUM_CLASSES]
F_OUT_PAD = 128   # last-layer weight padded 2 -> 128 cols (zero cols) so the
                  # final matmul is lane-aligned; only cols [:2] are stored.


def _round_up(x, m):
    return ((x + m - 1) // m) * m


def simplenet_kernel(x_ref, *refs):
    """Fused 7x (Linear + ReLU) forward pass.

    refs = (w0, b0, w1, b1, ..., w6, b6, out_ref)
    Weights are bf16 (MXU operands, f32 accumulate), biases f32.  All parameter
    tiles are VMEM-resident (<1 MB).  Bias + ReLU epilogue runs in f32 on the
    VPU; activations are cast back to bf16 between layers for the next matmul.
    Only the first NUM_CLASSES output columns are stored.
    """
    out_ref = refs[-1]
    param_refs = refs[:-1]
    n_layers = len(param_refs) // 2

    h = x_ref[...].astype(jnp.bfloat16)                    # (bb, 120) bf16
    for l in range(n_layers):
        w = param_refs[2 * l][...]                         # (in, out) bf16
        b = param_refs[2 * l + 1][...]                     # (1, out)  f32
        acc = jnp.dot(h, w, preferred_element_type=jnp.float32)   # MXU, f32 acc
        h32 = jnp.maximum(acc + b, 0.0)                    # f32 VPU epilogue
        if l < n_layers - 1:
            h = h32.astype(jnp.bfloat16)
        else:
            # h32 is (bb, 128) with zero-padded cols; store only the real ones.
            out_ref[...] = h32[:, : out_ref.shape[1]].astype(out_ref.dtype)


@functools.partial(jax.jit, static_argnames=("block_b",))
def _simplenet_forward_jit(x, params, block_b):
    B, F_in = x.shape
    assert F_in == LAYER_DIMS[0]
    n_layers = len(params)

    # Batch tile: at least 8 sublanes; clamp to ceil(B/2) so the grid always
    # has >= 2 "parallel" steps (v7x has 2 TensorCores per chip).  With a
    # cdiv grid + masked edge block, no batch padding is materialized in HBM.
    bb = min(block_b, max(8, _round_up((B + 1) // 2, 8)))
    grid = (pl.cdiv(B, bb),)

    flat_params = []
    in_specs = [pl.BlockSpec((bb, F_in), lambda i: (i, 0))]
    flops = 0
    param_bytes = 0
    for idx, (w, b) in enumerate(params):
        fan_in, fan_out = w.shape
        flops += 2 * B * fan_in * fan_out
        w_p, b_p = w, b
        if idx == n_layers - 1:
            # Pad N: 2 -> 128 with zero cols (relu(x@0+0)=0, sliced off on store).
            w_p = jnp.zeros((fan_in, F_OUT_PAD), w.dtype).at[:, :fan_out].set(w)
            b_p = jnp.zeros((1, F_OUT_PAD), b.dtype).at[:, :fan_out].set(b)
        flat_params.append(w_p.astype(jnp.bfloat16))   # MXU operand
        flat_params.append(b_p.astype(jnp.float32))    # f32 epilogue
        in_specs.append(pl.BlockSpec(flat_params[-2].shape, lambda i: (0, 0)))
        in_specs.append(pl.BlockSpec(flat_params[-1].shape, lambda i: (0, 0)))
        param_bytes += flat_params[-2].size * 2 + flat_params[-1].size * 4

    bytes_accessed = (x.size * x.dtype.itemsize
                      + B * NUM_CLASSES * 4
                      + param_bytes)
    cost = pl.CostEstimate(flops=flops, transcendentals=0,
                           bytes_accessed=bytes_accessed)

    out = pl.pallas_call(
        simplenet_kernel,
        out_shape=jax.ShapeDtypeStruct((B, NUM_CLASSES), jnp.float32),
        grid=grid,
        in_specs=in_specs,
        out_specs=pl.BlockSpec((bb, NUM_CLASSES), lambda i: (i, 0)),
        compiler_params=pltpu.CompilerParams(
            dimension_semantics=("parallel",)),
        cost_estimate=cost,
    )(x, *flat_params)
    return out


def simplenet_forward(x, params, block_b=1024):
    """x: (B, 120) float32.  params: list of (w, b), w: (in, out) f32, b: (1, out) f32.

    block_b: max batch tile.  It is automatically clamped to ceil(B/2) so both
    v7x TensorCores get grid steps; 1024 is a good default on v6e/v7x, 512-1024
    on v5e (more mostly adds intermediate spill there).
    """
    return _simplenet_forward_jit(x, tuple(params), block_b)


def init_params(key):
    """Deterministic init matching PyTorch nn.Linear default:
    W, b ~ U(-1/sqrt(in_features), +1/sqrt(in_features))."""
    params = []
    for l in range(len(LAYER_DIMS) - 1):
        fan_in, fan_out = LAYER_DIMS[l], LAYER_DIMS[l + 1]
        key, kw, kb = jax.random.split(key, 3)
        bound = 1.0 / (fan_in ** 0.5)
        w = jax.random.uniform(kw, (fan_in, fan_out), jnp.float32, -bound, bound)
        b = jax.random.uniform(kb, (1, fan_out), jnp.float32, -bound, bound)
        params.append((w, b))
    return params


def reference_forward_f32(x, params):
    """Pure-f32 reference (PyTorch semantics)."""
    h = x
    for (w, b) in params:
        h = jnp.maximum(jnp.dot(h, w) + b, 0.0)
    return h


def reference_forward_bf16(x, params):
    """Reference with the same bf16-operand / f32-accumulate math as the kernel."""
    h = x.astype(jnp.float32)
    for (w, b) in params:
        acc = jnp.dot(h.astype(jnp.bfloat16), w.astype(jnp.bfloat16),
                      preferred_element_type=jnp.float32)
        h = jnp.maximum(acc + b, 0.0)
    return h


if __name__ == "__main__":
    key = jax.random.PRNGKey(0)
    key, kx = jax.random.split(key)

    B = 8
    x = jax.random.normal(kx, (B, LAYER_DIMS[0]), dtype=jnp.float32)
    params = init_params(key)

    out = simplenet_forward(x, params)
    out = jax.block_until_ready(out)
    assert out.shape == (B, NUM_CLASSES), out.shape

    # Exact-math check vs a reference using identical bf16 MXU semantics.
    ref_bf16 = reference_forward_bf16(x, params)
    err_matched = float(jnp.max(jnp.abs(out - ref_bf16)))
    assert err_matched < 1e-3, err_matched

    # Loose check vs the pure-f32 PyTorch-semantics reference (bf16 trade-off).
    ref_f32 = reference_forward_f32(x, params)
    err_f32 = float(jnp.max(jnp.abs(out - ref_f32)))
    assert err_f32 < 5e-2, err_f32

    print("KERNEL_OK")
</pallas_src>

<mosaic_0001>
module attributes {stable_mosaic.version = 11 : i64} {
  func.func @simplenet_kernel(%arg0: i32, %arg1: memref<8x120xf32, #tpu.memory_space<vmem>>, %arg2: memref<120x128xbf16, #tpu.memory_space<vmem>>, %arg3: memref<1x128xf32, #tpu.memory_space<vmem>>, %arg4: memref<128x256xbf16, #tpu.memory_space<vmem>>, %arg5: memref<1x256xf32, #tpu.memory_space<vmem>>, %arg6: memref<256x512xbf16, #tpu.memory_space<vmem>>, %arg7: memref<1x512xf32, #tpu.memory_space<vmem>>, %arg8: memref<512x256xbf16, #tpu.memory_space<vmem>>, %arg9: memref<1x256xf32, #tpu.memory_space<vmem>>, %arg10: memref<256x128xbf16, #tpu.memory_space<vmem>>, %arg11: memref<1x128xf32, #tpu.memory_space<vmem>>, %arg12: memref<128x64xbf16, #tpu.memory_space<vmem>>, %arg13: memref<1x64xf32, #tpu.memory_space<vmem>>, %arg14: memref<64x128xbf16, #tpu.memory_space<vmem>>, %arg15: memref<1x128xf32, #tpu.memory_space<vmem>>, %arg16: memref<8x2xf32, #tpu.memory_space<vmem>>) attributes {dimension_semantics = [#tpu.dimension_semantics<parallel>], iteration_bounds = array<i64: 1>, scalar_prefetch = 0 : i64, scratch_operands = 0 : i64, tpu.core_type = #tpu.core_type<tc>, window_params = [{transform_indices = @transform_0, window_bounds = array<i64: 8, 120>}, {pipeline_mode = #tpu.pipeline_mode<synchronous>, transform_indices = @transform_1, window_bounds = array<i64: 120, 128>}, {pipeline_mode = #tpu.pipeline_mode<synchronous>, transform_indices = @transform_2, window_bounds = array<i64: 1, 128>}, {pipeline_mode = #tpu.pipeline_mode<synchronous>, transform_indices = @transform_3, window_bounds = array<i64: 128, 256>}, {pipeline_mode = #tpu.pipeline_mode<synchronous>, transform_indices = @transform_4, window_bounds = array<i64: 1, 256>}, {pipeline_mode = #tpu.pipeline_mode<synchronous>, transform_indices = @transform_5, window_bounds = array<i64: 256, 512>}, {pipeline_mode = #tpu.pipeline_mode<synchronous>, transform_indices = @transform_6, window_bounds = array<i64: 1, 512>}, {pipeline_mode = #tpu.pipeline_mode<synchronous>, transform_indices = @transform_7, window_bounds = array<i64: 512, 256>}, {pipeline_mode = #tpu.pipeline_mode<synchronous>, transform_indices = @transform_8, window_bounds = array<i64: 1, 256>}, {pipeline_mode = #tpu.pipeline_mode<synchronous>, transform_indices = @transform_9, window_bounds = array<i64: 256, 128>}, {pipeline_mode = #tpu.pipeline_mode<synchronous>, transform_indices = @transform_10, window_bounds = array<i64: 1, 128>}, {pipeline_mode = #tpu.pipeline_mode<synchronous>, transform_indices = @transform_11, window_bounds = array<i64: 128, 64>}, {pipeline_mode = #tpu.pipeline_mode<synchronous>, transform_indices = @transform_12, window_bounds = array<i64: 1, 64>}, {pipeline_mode = #tpu.pipeline_mode<synchronous>, transform_indices = @transform_13, window_bounds = array<i64: 64, 128>}, {pipeline_mode = #tpu.pipeline_mode<synchronous>, transform_indices = @transform_14, window_bounds = array<i64: 1, 128>}, {transform_indices = @transform_15, window_bounds = array<i64: 8, 2>}]} {
    %c0 = arith.constant 0 : index
    %c0_0 = arith.constant 0 : index
    %0 = vector.load %arg1[%c0, %c0_0] : memref<8x120xf32, #tpu.memory_space<vmem>>, vector<8x120xf32>
    %1 = arith.truncf %0 : vector<8x120xf32> to vector<8x120xbf16>
    %c0_1 = arith.constant 0 : index
    %c0_2 = arith.constant 0 : index
    %2 = vector.load %arg2[%c0_1, %c0_2] : memref<120x128xbf16, #tpu.memory_space<vmem>>, vector<120x128xbf16>
    %c0_3 = arith.constant 0 : index
    %c0_4 = arith.constant 0 : index
    %3 = vector.load %arg3[%c0_3, %c0_4] : memref<1x128xf32, #tpu.memory_space<vmem>>, vector<1x128xf32>
    %cst = arith.constant dense<0.000000e+00> : vector<8x128xf32>
    %4 = tpu.matmul %1, %2, %cst {dimension_numbers = #tpu.dot_dimension_numbers<[1], [0], [0], [1], [0, 0, 1, 1], [], []>} : vector<8x120xbf16>, vector<120x128xbf16>, vector<8x128xf32> -> vector<8x128xf32>
    %5 = vector.broadcast %3 : vector<1x128xf32> to vector<8x128xf32>
    %6 = arith.addf %4, %5 : vector<8x128xf32>
    %cst_5 = arith.constant 0.000000e+00 : f32
    %7 = vector.broadcast %cst_5 : f32 to vector<8x128xf32>
    %8 = arith.maximumf %6, %7 : vector<8x128xf32>
    %9 = arith.truncf %8 : vector<8x128xf32> to vector<8x128xbf16>
    %c0_6 = arith.constant 0 : index
    %c0_7 = arith.constant 0 : index
    %10 = vector.load %arg4[%c0_6, %c0_7] : memref<128x256xbf16, #tpu.memory_space<vmem>>, vector<128x256xbf16>
    %c0_8 = arith.constant 0 : index
    %c0_9 = arith.constant 0 : index
    %11 = vector.load %arg5[%c0_8, %c0_9] : memref<1x256xf32, #tpu.memory_space<vmem>>, vector<1x256xf32>
    %cst_10 = arith.constant dense<0.000000e+00> : vector<8x256xf32>
    %12 = tpu.matmul %9, %10, %cst_10 {dimension_numbers = #tpu.dot_dimension_numbers<[1], [0], [0], [1], [0, 0, 1, 1], [], []>} : vector<8x128xbf16>, vector<128x256xbf16>, vector<8x256xf32> -> vector<8x256xf32>
    %13 = vector.broadcast %11 : vector<1x256xf32> to vector<8x256xf32>
    %14 = arith.addf %12, %13 : vector<8x256xf32>
    %cst_11 = arith.constant 0.000000e+00 : f32
    %15 = vector.broadcast %cst_11 : f32 to vector<8x256xf32>
    %16 = arith.maximumf %14, %15 : vector<8x256xf32>
    %17 = arith.truncf %16 : vector<8x256xf32> to vector<8x256xbf16>
    %c0_12 = arith.constant 0 : index
    %c0_13 = arith.constant 0 : index
    %18 = vector.load %arg6[%c0_12, %c0_13] : memref<256x512xbf16, #tpu.memory_space<vmem>>, vector<256x512xbf16>
    %c0_14 = arith.constant 0 : index
    %c0_15 = arith.constant 0 : index
    %19 = vector.load %arg7[%c0_14, %c0_15] : memref<1x512xf32, #tpu.memory_space<vmem>>, vector<1x512xf32>
    %cst_16 = arith.constant dense<0.000000e+00> : vector<8x512xf32>
    %20 = tpu.matmul %17, %18, %cst_16 {dimension_numbers = #tpu.dot_dimension_numbers<[1], [0], [0], [1], [0, 0, 1, 1], [], []>} : vector<8x256xbf16>, vector<256x512xbf16>, vector<8x512xf32> -> vector<8x512xf32>
    %21 = vector.broadcast %19 : vector<1x512xf32> to vector<8x512xf32>
    %22 = arith.addf %20, %21 : vector<8x512xf32>
    %cst_17 = arith.constant 0.000000e+00 : f32
    %23 = vector.broadcast %cst_17 : f32 to vector<8x512xf32>
    %24 = arith.maximumf %22, %23 : vector<8x512xf32>
    %25 = arith.truncf %24 : vector<8x512xf32> to vector<8x512xbf16>
    %c0_18 = arith.constant 0 : index
    %c0_19 = arith.constant 0 : index
    %26 = vector.load %arg8[%c0_18, %c0_19] : memref<512x256xbf16, #tpu.memory_space<vmem>>, vector<512x256xbf16>
    %c0_20 = arith.constant 0 : index
    %c0_21 = arith.constant 0 : index
    %27 = vector.load %arg9[%c0_20, %c0_21] : memref<1x256xf32, #tpu.memory_space<vmem>>, vector<1x256xf32>
    %cst_22 = arith.constant dense<0.000000e+00> : vector<8x256xf32>
    %28 = tpu.matmul %25, %26, %cst_22 {dimension_numbers = #tpu.dot_dimension_numbers<[1], [0], [0], [1], [0, 0, 1, 1], [], []>} : vector<8x512xbf16>, vector<512x256xbf16>, vector<8x256xf32> -> vector<8x256xf32>
    %29 = vector.broadcast %27 : vector<1x256xf32> to vector<8x256xf32>
    %30 = arith.addf %28, %29 : vector<8x256xf32>
    %cst_23 = arith.constant 0.000000e+00 : f32
    %31 = vector.broadcast %cst_23 : f32 to vector<8x256xf32>
    %32 = arith.maximumf %30, %31 : vector<8x256xf32>
    %33 = arith.truncf %32 : vector<8x256xf32> to vector<8x256xbf16>
    %c0_24 = arith.constant 0 : index
    %c0_25 = arith.constant 0 : index
    %34 = vector.load %arg10[%c0_24, %c0_25] : memref<256x128xbf16, #tpu.memory_space<vmem>>, vector<256x128xbf16>
    %c0_26 = arith.constant 0 : index
    %c0_27 = arith.constant 0 : index
    %35 = vector.load %arg11[%c0_26, %c0_27] : memref<1x128xf32, #tpu.memory_space<vmem>>, vector<1x128xf32>
    %cst_28 = arith.constant dense<0.000000e+00> : vector<8x128xf32>
    %36 = tpu.matmul %33, %34, %cst_28 {dimension_numbers = #tpu.dot_dimension_numbers<[1], [0], [0], [1], [0, 0, 1, 1], [], []>} : vector<8x256xbf16>, vector<256x128xbf16>, vector<8x128xf32> -> vector<8x128xf32>
    %37 = vector.broadcast %35 : vector<1x128xf32> to vector<8x128xf32>
    %38 = arith.addf %36, %37 : vector<8x128xf32>
    %cst_29 = arith.constant 0.000000e+00 : f32
    %39 = vector.broadcast %cst_29 : f32 to vector<8x128xf32>
    %40 = arith.maximumf %38, %39 : vector<8x128xf32>
    %41 = arith.truncf %40 : vector<8x128xf32> to vector<8x128xbf16>
    %c0_30 = arith.constant 0 : index
    %c0_31 = arith.constant 0 : index
    %42 = vector.load %arg12[%c0_30, %c0_31] : memref<128x64xbf16, #tpu.memory_space<vmem>>, vector<128x64xbf16>
    %c0_32 = arith.constant 0 : index
    %c0_33 = arith.constant 0 : index
    %43 = vector.load %arg13[%c0_32, %c0_33] : memref<1x64xf32, #tpu.memory_space<vmem>>, vector<1x64xf32>
    %cst_34 = arith.constant dense<0.000000e+00> : vector<8x64xf32>
    %44 = tpu.matmul %41, %42, %cst_34 {dimension_numbers = #tpu.dot_dimension_numbers<[1], [0], [0], [1], [0, 0, 1, 1], [], []>} : vector<8x128xbf16>, vector<128x64xbf16>, vector<8x64xf32> -> vector<8x64xf32>
    %45 = vector.broadcast %43 : vector<1x64xf32> to vector<8x64xf32>
    %46 = arith.addf %44, %45 : vector<8x64xf32>
    %cst_35 = arith.constant 0.000000e+00 : f32
    %47 = vector.broadcast %cst_35 : f32 to vector<8x64xf32>
    %48 = arith.maximumf %46, %47 : vector<8x64xf32>
    %49 = arith.truncf %48 : vector<8x64xf32> to vector<8x64xbf16>
    %c0_36 = arith.constant 0 : index
    %c0_37 = arith.constant 0 : index
    %50 = vector.load %arg14[%c0_36, %c0_37] : memref<64x128xbf16, #tpu.memory_space<vmem>>, vector<64x128xbf16>
    %c0_38 = arith.constant 0 : index
    %c0_39 = arith.constant 0 : index
    %51 = vector.load %arg15[%c0_38, %c0_39] : memref<1x128xf32, #tpu.memory_space<vmem>>, vector<1x128xf32>
    %cst_40 = arith.constant dense<0.000000e+00> : vector<8x128xf32>
    %52 = tpu.matmul %49, %50, %cst_40 {dimension_numbers = #tpu.dot_dimension_numbers<[1], [0], [0], [1], [0, 0, 1, 1], [], []>} : vector<8x64xbf16>, vector<64x128xbf16>, vector<8x128xf32> -> vector<8x128xf32>
    %53 = vector.broadcast %51 : vector<1x128xf32> to vector<8x128xf32>
    %54 = arith.addf %52, %53 : vector<8x128xf32>
    %cst_41 = arith.constant 0.000000e+00 : f32
    %55 = vector.broadcast %cst_41 : f32 to vector<8x128xf32>
    %56 = arith.maximumf %54, %55 : vector<8x128xf32>
    %57 = vector.extract_strided_slice %56 {offsets = [0, 0], sizes = [8, 2], strides = [1, 1]} : vector<8x128xf32> to vector<8x2xf32>
    %c0_42 = arith.constant 0 : index
    %c0_43 = arith.constant 0 : index
    %58 = vector.load %arg16[%c0_42, %c0_43] : memref<8x2xf32, #tpu.memory_space<vmem>>, vector<8x2xf32>
    tpu.vector_store %arg16[%c0_42, %c0_43], %57 {strides = array<i32>} : memref<8x2xf32, #tpu.memory_space<vmem>>, vector<8x2xf32>,
    return
  }
  func.func @transform_0(%arg0: i32) -> (i32, i32) {
    %c0_i32 = arith.constant 0 : i32
    %c0_i32_0 = arith.constant 0 : i32
    return %arg0, %c0_i32 : i32, i32
  }
  func.func @transform_1(%arg0: i32) -> (i32, i32) {
    %c0_i32 = arith.constant 0 : i32
    %c0_i32_0 = arith.constant 0 : i32
    %c0_i32_1 = arith.constant 0 : i32
    return %c0_i32, %c0_i32_0 : i32, i32
  }
  func.func @transform_2(%arg0: i32) -> (i32, i32) {
    %c0_i32 = arith.constant 0 : i32
    %c0_i32_0 = arith.constant 0 : i32
    %c0_i32_1 = arith.constant 0 : i32
    return %c0_i32, %c0_i32_0 : i32, i32
  }
  func.func @transform_3(%arg0: i32) -> (i32, i32) {
    %c0_i32 = arith.constant 0 : i32
    %c0_i32_0 = arith.constant 0 : i32
    %c0_i32_1 = arith.constant 0 : i32
    return %c0_i32, %c0_i32_0 : i32, i32
  }
  func.func @transform_4(%arg0: i32) -> (i32, i32) {
    %c0_i32 = arith.constant 0 : i32
    %c0_i32_0 = arith.constant 0 : i32
    %c0_i32_1 = arith.constant 0 : i32
    return %c0_i32, %c0_i32_0 : i32, i32
  }
  func.func @transform_5(%arg0: i32) -> (i32, i32) {
    %c0_i32 = arith.constant 0 : i32
    %c0_i32_0 = arith.constant 0 : i32
    %c0_i32_1 = arith.constant 0 : i32
    return %c0_i32, %c0_i32_0 : i32, i32
  }
  func.func @transform_6(%arg0: i32) -> (i32, i32) {
    %c0_i32 = arith.constant 0 : i32
    %c0_i32_0 = arith.constant 0 : i32
    %c0_i32_1 = arith.constant 0 : i32
    return %c0_i32, %c0_i32_0 : i32, i32
  }
  func.func @transform_7(%arg0: i32) -> (i32, i32) {
    %c0_i32 = arith.constant 0 : i32
    %c0_i32_0 = arith.constant 0 : i32
    %c0_i32_1 = arith.constant 0 : i32
    return %c0_i32, %c0_i32_0 : i32, i32
  }
  func.func @transform_8(%arg0: i32) -> (i32, i32) {
    %c0_i32 = arith.constant 0 : i32
    %c0_i32_0 = arith.constant 0 : i32
    %c0_i32_1 = arith.constant 0 : i32
    return %c0_i32, %c0_i32_0 : i32, i32
  }
  func.func @transform_9(%arg0: i32) -> (i32, i32) {
    %c0_i32 = arith.constant 0 : i32
    %c0_i32_0 = arith.constant 0 : i32
    %c0_i32_1 = arith.constant 0 : i32
    return %c0_i32, %c0_i32_0 : i32, i32
  }
  func.func @transform_10(%arg0: i32) -> (i32, i32) {
    %c0_i32 = arith.constant 0 : i32
    %c0_i32_0 = arith.constant 0 : i32
    %c0_i32_1 = arith.constant 0 : i32
    return %c0_i32, %c0_i32_0 : i32, i32
  }
  func.func @transform_11(%arg0: i32) -> (i32, i32) {
    %c0_i32 = arith.constant 0 : i32
    %c0_i32_0 = arith.constant 0 : i32
    %c0_i32_1 = arith.constant 0 : i32
    return %c0_i32, %c0_i32_0 : i32, i32
  }
  func.func @transform_12(%arg0: i32) -> (i32, i32) {
    %c0_i32 = arith.constant 0 : i32
    %c0_i32_0 = arith.constant 0 : i32
    %c0_i32_1 = arith.constant 0 : i32
    return %c0_i32, %c0_i32_0 : i32, i32
  }
  func.func @transform_13(%arg0: i32) -> (i32, i32) {
    %c0_i32 = arith.constant 0 : i32
    %c0_i32_0 = arith.constant 0 : i32
    %c0_i32_1 = arith.constant 0 : i32
    return %c0_i32, %c0_i32_0 : i32, i32
  }
  func.func @transform_14(%arg0: i32) -> (i32, i32) {
    %c0_i32 = arith.constant 0 : i32
    %c0_i32_0 = arith.constant 0 : i32
    %c0_i32_1 = arith.constant 0 : i32
    return %c0_i32, %c0_i32_0 : i32, i32
  }
  func.func @transform_15(%arg0: i32) -> (i32, i32) {
    %c0_i32 = arith.constant 0 : i32
    %c0_i32_0 = arith.constant 0 : i32
    return %arg0, %c0_i32 : i32, i32
  }
}

</mosaic_0001>

<bundles_post_ra>
// kernel: _simplenet_forward_jit.1
= control target key start
LH: loop header
LB: loop body
LE: loop exit
PB: predicated region body
PF: predicated region fallthrough
CT: control target
= control target key end

     0   :  { %vm121_vm0 = vcmask 1043456   ;;  %vm117_vm1 = vcmask 982016   ;;  %vm1555_vm2 = vcmask 523264   ;;  %vm1573_vm3 = vcmask 15360   ;;  %s3565_s1 = inlined_call_operand.vmem [shape: bf16[120,128], index: 1, kind: input, shape index: {}]   ;;  %s3566_s3 = inlined_call_operand.vmem [shape: bf16[128,256], index: 3, kind: input, shape index: {}]   ;;  %s3567_s2 = inlined_call_operand.vmem [shape: f32[1,128], index: 2, kind: input, shape index: {}]   ;;  %s3568_s0 = inlined_call_operand.vmem [shape: f32[8,120], index: 0, kind: input, shape index: {}]   ;;  %s3569_s5 = inlined_call_operand.vmem [shape: bf16[256,512], index: 5, kind: input, shape index: {}]   ;;  %s3570_s4 = inlined_call_operand.vmem [shape: f32[1,256], index: 4, kind: input, shape index: {}]   ;;  %s3571_s7 = inlined_call_operand.vmem [shape: bf16[512,256], index: 7, kind: input, shape index: {}]   ;;  %s3572_s6 = inlined_call_operand.vmem [shape: f32[1,512], index: 6, kind: input, shape index: {}]   ;;  %s3573_s9 = inlined_call_operand.vmem [shape: bf16[256,128], index: 9, kind: input, shape index: {}]   ;;  %s3574_s10 = inlined_call_operand.vmem [shape: f32[1,128], index: 10, kind: input, shape index: {}]   ;;  %s3575_s8 = inlined_call_operand.vmem [shape: f32[1,256], index: 8, kind: input, shape index: {}]   ;;  %s3576_s11 = inlined_call_operand.vmem [shape: bf16[128,64], index: 11, kind: input, shape index: {}]   ;;  %s3577_s12 = inlined_call_operand.vmem [shape: f32[1,64], index: 12, kind: input, shape index: {}]   ;;  %s3578_s13 = inlined_call_operand.vmem [shape: bf16[64,128], index: 13, kind: input, shape index: {}]   ;;  %s3579_s14 = inlined_call_operand.vmem [shape: f32[1,128], index: 14, kind: input, shape index: {}]   ;;  %s3580_s15 = inlined_call_operand.vmem [shape: f32[8,2], index: 15, kind: output, shape index: {}]  }
   0x1   :  { %v67_v0 = vld [vmem:[%s3565_s1 + $0x38] sm:$0xf]  ;;  %v2303_v4 = vld [vmem:[%s3565_s1 + $0x30] sm:$0xff]  ;;  %v1668_v9 = vld [vmem:[%s3566_s3 + $0x78] sm:$0xf0] }
   0x2   :  { %v101_v1 = vunpack.c.l.b16 %v67_v0  ;;  %v1666_v5 = vld [vmem:[%s3566_s3 + $0x70] sm:$0xf]  ;;  %v2319_v6 = vld [vmem:[%s3566_s3 + $0x74] sm:$0xf0]  ;;  %v2318_v8 = vld [vmem:[%s3566_s3 + $0x74] sm:$0xf] }
   0x3   :  { %v1667_v7 = vor.u32 %v2319_v6, %v1666_v5  ;;  %v1658_v10 = vld [vmem:[%s3566_s3 + $0x60] sm:$0xf]  ;;  %v1671_v11 = vor.u32 %v2318_v8, %v1668_v9  ;;  %v2317_v12 = vld [vmem:[%s3566_s3 + $0x64] sm:$0xf0]  ;;  %v2316_v13 = vld [vmem:[%s3566_s3 + $0x64] sm:$0xf] }
   0x4   :  { %v109_v2 = vpack.c.b16 %v101_v1, %v101_v1  ;;  %v1660_v14 = vld [vmem:[%s3566_s3 + $0x68] sm:$0xf0]  ;;  %v1659_v15 = vor.u32 %v2317_v12, %v1658_v10  ;;  %v1650_v17 = vld [vmem:[%s3566_s3 + $0x50] sm:$0xf]  ;;  %v2315_v18 = vld [vmem:[%s3566_s3 + $0x54] sm:$0xf0] }
   0x5   :  { %242 = vmatpush.bf16.msra.mxu1 %v1667_v7  ;;  %255 = vmatpush.bf16.msra.mxu2 %v1671_v11  ;;  %v1663_v16 = vor.u32 %v2316_v13, %v1660_v14  ;;  %v2302_v19 = vld [vmem:[%s3565_s1 + $0x28] sm:$0xff]  ;;  %v2314_v20 = vld [vmem:[%s3566_s3 + $0x54] sm:$0xf]  ;;  %v1652_v21 = vld [vmem:[%s3566_s3 + $0x58] sm:$0xf0]  ;;  %v1651_v22 = vor.u32 %v2315_v18, %v1650_v17 }
   0x6   :  { %v123_v3 = vsel %vm121_vm0, %v109_v2, 0  ;;  %v1655_v23 = vor.u32 %v2314_v20, %v1652_v21  ;;  %v1642_v24 = vld [vmem:[%s3566_s3 + $0x40] sm:$0xf]  ;;  %v2313_v25 = vld [vmem:[%s3566_s3 + $0x44] sm:$0xf0]  ;;  %v2300_v33 = vld [vmem:[%s3565_s1 + $0x18] sm:$0xff] }
   0x7   :  { %125 = vmatpush.bf16.msra.mxu0 %v123_v3  ;;  %v2301_v26 = vld [vmem:[%s3565_s1 + $0x20] sm:$0xff]  ;;  %v1644_v28 = vld [vmem:[%s3566_s3 + $0x48] sm:$0xf0]  ;;  %v1643_v29 = vor.u32 %v2313_v25, %v1642_v24  ;;  %v1634_v31 = vld [vmem:[%s3566_s3 + $0x30] sm:$0xf] }
   0x8   :  { %v2312_v27 = vld [vmem:[%s3566_s3 + $0x44] sm:$0xf]  ;;  %v2311_v32 = vld [vmem:[%s3566_s3 + $0x34] sm:$0xf0]  ;;  %v2310_v34 = vld [vmem:[%s3566_s3 + $0x34] sm:$0xf] }
   0x9   :  { %243 = vmatpush.bf16.msra.mxu1 %v1659_v15  ;;  %256 = vmatpush.bf16.msra.mxu2 %v1663_v16  ;;  %v1647_v30 = vor.u32 %v2312_v27, %v1644_v28  ;;  %v1636_v35 = vld [vmem:[%s3566_s3 + $0x38] sm:$0xf0]  ;;  %v1635_v36 = vor.u32 %v2311_v32, %v1634_v31  ;;  %v1626_v38 = vld [vmem:[%s3566_s3 + $0x20] sm:$0xf]  ;;  %v2309_v39 = vld [vmem:[%s3566_s3 + $0x24] sm:$0xf0] }
   0xa   :  { %v1639_v37 = vor.u32 %v2310_v34, %v1636_v35  ;;  %v2299_v40 = vld [vmem:[%s3565_s1 + $0x10] sm:$0xff]  ;;  %v2308_v41 = vld [vmem:[%s3566_s3 + $0x24] sm:$0xf]  ;;  %v1628_v42 = vld [vmem:[%s3566_s3 + $0x28] sm:$0xf0]  ;;  %v1627_v43 = vor.u32 %v2309_v39, %v1626_v38 }
   0xb   :  { %126 = vmatpush.bf16.msra.mxu0 %v2303_v4  ;;  %v1631_v44 = vor.u32 %v2308_v41, %v1628_v42  ;;  %v2298_v45 = vld [vmem:[%s3565_s1 + $0x8] sm:$0xff]  ;;  %v2297_v46 = vld [vmem:[%s3565_s1] sm:$0xff]  ;;  %v1618_v49 = vld [vmem:[%s3566_s3 + $0x10] sm:$0xf] }
   0xc   :  { %v51_v47 = vld [vmem:[%s3568_s0] sm:$0xff]  ;;  %v2307_v50 = vld [vmem:[%s3566_s3 + $0x14] sm:$0xf0]  ;;  %v2306_v51 = vld [vmem:[%s3566_s3 + $0x14] sm:$0xf] }
   0xd   :  { %244 = vmatpush.bf16.msra.mxu1 %v1651_v22  ;;  %257 = vmatpush.bf16.msra.mxu2 %v1655_v23  ;;  %v52_v48 = vpack.c.bf16 %v51_v47, %v51_v47  ;;  %v1619_v52 = vor.u32 %v2307_v50, %v1618_v49  ;;  %v1620_v53 = vld [vmem:[%s3566_s3 + $0x18] sm:$0xf0]  ;;  %v1610_v55 = vld [vmem:[%s3566_s3] sm:$0xf]  ;;  %v2305_v56 = vld [vmem:[%s3566_s3 + $0x4] sm:$0xf0] }
   0xe   :  { %v1623_v54 = vor.u32 %v2306_v51, %v1620_v53  ;;  %v2304_v57 = vld [vmem:[%s3566_s3 + $0x4] sm:$0xf]  ;;  %v1611_v58 = vor.u32 %v2305_v56, %v1610_v55  ;;  %v1612_v59 = vld [vmem:[%s3566_s3 + $0x8] sm:$0xf0]  ;;  %v1786_v61 = vld [vmem:[%s3569_s5 + $0xe0] sm:$0xf] }
   0xf   :  { %127 = vmatpush.bf16.msra.mxu0 %v2302_v19  ;;  %v1615_v60 = vor.u32 %v2304_v57, %v1612_v59  ;;  %v2350_v62 = vld [vmem:[%s3569_s5 + $0xec] sm:$0xf0]  ;;  %v2348_v63 = vld [vmem:[%s3569_s5 + $0xe4] sm:$0xf]  ;;  %v1788_v1 = vld [vmem:[%s3569_s5 + $0xf0] sm:$0xf0] }
  0x10   :  { %v1787_v0 = vor.u32 %v2350_v62, %v1786_v61  ;;  %v1770_v2 = vld [vmem:[%s3569_s5 + $0xc0] sm:$0xf]  ;;  %v2346_v3 = vld [vmem:[%s3569_s5 + $0xcc] sm:$0xf0]  ;;  %v1791_v4 = vor.u32 %v2348_v63, %v1788_v1  ;;  %v2344_v5 = vld [vmem:[%s3569_s5 + $0xc4] sm:$0xf] }
  0x11   :  { %245 = vmatpush.bf16.msra.mxu1 %v1643_v29  ;;  %258 = vmatpush.bf16.msra.mxu2 %v1647_v30  ;;  %v1772_v6 = vld [vmem:[%s3569_s5 + $0xd0] sm:$0xf0]  ;;  %v1914_v7 = vld [vmem:[%s3569_s5 + $0x1e0] sm:$0xf]  ;;  %v1771_v8 = vor.u32 %v2346_v3, %v1770_v2  ;;  %v2382_v9 = vld [vmem:[%s3569_s5 + $0x1ec] sm:$0xf0] }
  0x12   :  { %666 = vmatpush.bf16.msra.mxu3 %v1787_v0  ;;  %v2380_v10 = vld [vmem:[%s3569_s5 + $0x1e4] sm:$0xf]  ;;  %v1916_v11 = vld [vmem:[%s3569_s5 + $0x1f0] sm:$0xf0]  ;;  %v1775_v12 = vor.u32 %v2344_v5, %v1772_v6  ;;  %v1915_v13 = vor.u32 %v2382_v9, %v1914_v7  ;;  %v1754_v15 = vld [vmem:[%s3569_s5 + $0xa0] sm:$0xf] }
  0x13   :  { %128 = vmatpush.bf16.msra.mxu0 %v2301_v26  ;;  %v1919_v14 = vor.u32 %v2380_v10, %v1916_v11  ;;  %v2342_v16 = vld [vmem:[%s3569_s5 + $0xac] sm:$0xf0]  ;;  %v2340_v17 = vld [vmem:[%s3569_s5 + $0xa4] sm:$0xf]  ;;  %v1756_v18 = vld [vmem:[%s3569_s5 + $0xb0] sm:$0xf0] }
  0x14   :  { %v1898_v19 = vld [vmem:[%s3569_s5 + $0x1c0] sm:$0xf]  ;;  %v2378_v20 = vld [vmem:[%s3569_s5 + $0x1cc] sm:$0xf0]  ;;  %v2376_v22 = vld [vmem:[%s3569_s5 + $0x1c4] sm:$0xf]  ;;  %v1755_v24 = vor.u32 %v2342_v16, %v1754_v15  ;;  %v1759_v28 = vor.u32 %v2340_v17, %v1756_v18 }
  0x15   :  { %246 = vmatpush.bf16.msra.mxu1 %v1635_v36  ;;  %259 = vmatpush.bf16.msra.mxu2 %v1639_v37  ;;  %v1899_v21 = vor.u32 %v2378_v20, %v1898_v19  ;;  %v1900_v23 = vld [vmem:[%s3569_s5 + $0x1d0] sm:$0xf0]  ;;  %v1738_v26 = vld [vmem:[%s3569_s5 + $0x80] sm:$0xf]  ;;  %v2338_v27 = vld [vmem:[%s3569_s5 + $0x8c] sm:$0xf0] }
  0x16   :  { %667 = vmatpush.bf16.msra.mxu3 %v1771_v8  ;;  %v1903_v25 = vor.u32 %v2376_v22, %v1900_v23  ;;  %v1882_v29 = vld [vmem:[%s3569_s5 + $0x1a0] sm:$0xf]  ;;  %v2374_v30 = vld [vmem:[%s3569_s5 + $0x1ac] sm:$0xf0]  ;;  %v2372_v31 = vld [vmem:[%s3569_s5 + $0x1a4] sm:$0xf]  ;;  %v1739_v38 = vor.u32 %v2338_v27, %v1738_v26 }
  0x17   :  { %129 = vmatpush.bf16.msra.mxu0 %v2300_v33  ;;  %v2336_v32 = vld [vmem:[%s3569_s5 + $0x84] sm:$0xf]  ;;  %v1740_v33 = vld [vmem:[%s3569_s5 + $0x90] sm:$0xf0]  ;;  %v1883_v35 = vor.u32 %v2374_v30, %v1882_v29  ;;  %v1866_v37 = vld [vmem:[%s3569_s5 + $0x180] sm:$0xf] }
  0x18   :  { %v1884_v34 = vld [vmem:[%s3569_s5 + $0x1b0] sm:$0xf0]  ;;  %v2370_v39 = vld [vmem:[%s3569_s5 + $0x18c] sm:$0xf0]  ;;  %v1743_v42 = vor.u32 %v2336_v32, %v1740_v33  ;;  %v1850_v49 = vld [vmem:[%s3569_s5 + $0x160] sm:$0xf] }
  0x19   :  { %247 = vmatpush.bf16.msra.mxu1 %v1627_v43  ;;  %260 = vmatpush.bf16.msra.mxu2 %v1631_v44  ;;  %v1887_v36 = vor.u32 %v2372_v31, %v1884_v34  ;;  %v1868_v41 = vld [vmem:[%s3569_s5 + $0x190] sm:$0xf0]  ;;  %v1722_v43 = vld [vmem:[%s3569_s5 + $0x60] sm:$0xf]  ;;  %v2334_v44 = vld [vmem:[%s3569_s5 + $0x6c] sm:$0xf0]  ;;  %v1867_v47 = vor.u32 %v2370_v39, %v1866_v37 }
  0x1a   :  { %668 = vmatpush.bf16.msra.mxu3 %v1755_v24  ;;  %v1723_v50 = vor.u32 %v2334_v44, %v1722_v43  ;;  %v2366_v51 = vld [vmem:[%s3569_s5 + $0x16c] sm:$0xf0]  ;;  %v1852_v53 = vld [vmem:[%s3569_s5 + $0x170] sm:$0xf0]  ;;  %v1706_v55 = vld [vmem:[%s3569_s5 + $0x40] sm:$0xf] }
  0x1b   :  { %130 = vmatpush.bf16.msra.mxu0 %v2299_v40  ;;  %v2368_v40 = vld [vmem:[%s3569_s5 + $0x184] sm:$0xf]  ;;  %v2330_v56 = vld [vmem:[%s3569_s5 + $0x4c] sm:$0xf0]  ;;  %v1851_v59 = vor.u32 %v2366_v51, %v1850_v49  ;;  %v1834_v61 = vld [vmem:[%s3569_s5 + $0x140] sm:$0xf] }
  0x1c   :  { %v2328_v57 = vld [vmem:[%s3569_s5 + $0x44] sm:$0xf]  ;;  %v1707_v62 = vor.u32 %v2330_v56, %v1706_v55  ;;  %v2362_v63 = vld [vmem:[%s3569_s5 + $0x14c] sm:$0xf0]  ;;  %v1836_v1 = vld [vmem:[%s3569_s5 + $0x150] sm:$0xf0] }
  0x1d   :  { %248 = vmatpush.bf16.msra.mxu1 %v1619_v52  ;;  %261 = vmatpush.bf16.msra.mxu2 %v1623_v54  ;;  %v2364_v52 = vld [vmem:[%s3569_s5 + $0x164] sm:$0xf]  ;;  %v1690_v3 = vld [vmem:[%s3569_s5 + $0x20] sm:$0xf]  ;;  %v1692_v7 = vld [vmem:[%s3569_s5 + $0x30] sm:$0xf0]  ;;  %v1835_v8 = vor.u32 %v2362_v63, %v1834_v61 }
  0x1e   :  { %669 = vmatpush.bf16.msra.mxu3 %v1739_v38  ;;  %v2360_v0 = vld [vmem:[%s3569_s5 + $0x144] sm:$0xf]  ;;  %v2476_v5 = vld [vmem:[%s3567_s2] ss:$0 sm:$0xff]  ;;  %v1820_v16 = vld [vmem:[%s3569_s5 + $0x130] sm:$0xf0] }
  0x1f   :  { %131 = vmatpush.bf16.msra.mxu0 %v2298_v45  ;;  %v2332_v45 = vld [vmem:[%s3569_s5 + $0x64] sm:$0xf]  ;;  %v1839_v9 = vor.u32 %v2360_v0, %v1836_v1  ;;  %v1818_v10 = vld [vmem:[%s3569_s5 + $0x120] sm:$0xf]  ;;  %v1676_v20 = vld [vmem:[%s3569_s5 + $0x10] sm:$0xf0] }
  0x20   :  { %v2324_v6 = vld [vmem:[%s3569_s5 + $0x24] sm:$0xf]  ;;  %v2351_v23 = vld [vmem:[%s3569_s5 + $0xf4] sm:$0xf0]  ;;  %v2349_v24 = vld [vmem:[%s3569_s5 + $0xec] sm:$0xf] }
  0x21   :  { %249 = vmatpush.bf16.msra.mxu1 %v1611_v58  ;;  %262 = vmatpush.bf16.msra.mxu2 %v1615_v60  ;;  %v1708_v58 = vld [vmem:[%s3569_s5 + $0x50] sm:$0xf0]  ;;  %v1855_v60 = vor.u32 %v2364_v52, %v1852_v53  ;;  %v2356_v15 = vld [vmem:[%s3569_s5 + $0x124] sm:$0xf]  ;;  %v1695_v18 = vor.u32 %v2324_v6, %v1692_v7  ;;  %v2354_v29 = vld [vmem:[%s3569_s5 + $0x10c] sm:$0xf0] }
  0x22   :  { %670 = vmatpush.bf16.msra.mxu3 %v1723_v50  ;;  %v1711_v2 = vor.u32 %v2328_v57, %v1708_v58  ;;  %v2320_v19 = vld [vmem:[%s3569_s5 + $0x4] sm:$0xf]  ;;  %v1823_v27 = vor.u32 %v2356_v15, %v1820_v16  ;;  %v1804_v32 = vld [vmem:[%s3569_s5 + $0x110] sm:$0xf0]  ;;  %v1922_v33 = vld [vmem:[%s3569_s5 + $0x1e8] sm:$0xf] }
  0x23   :  { %132 = vmatpush.bf16.msra.mxu0 %v2297_v46  ;;  %v1724_v46 = vld [vmem:[%s3569_s5 + $0x70] sm:$0xf0]  ;;  %v2352_v30 = vld [vmem:[%s3569_s5 + $0x104] sm:$0xf]  ;;  %v2381_v37 = vld [vmem:[%s3569_s5 + $0x1ec] sm:$0xf] }
  0x24   :  { %v1727_v54 = vor.u32 %v2332_v45, %v1724_v46  ;;  %v1924_v38 = vld [vmem:[%s3569_s5 + $0x1f8] sm:$0xf0]  ;;  %v2347_v43 = vld [vmem:[%s3569_s5 + $0xd4] sm:$0xf0]  ;;  %v2345_v44 = vld [vmem:[%s3569_s5 + $0xcc] sm:$0xf] }
  0x25   :  { %692 = vmatpush.bf16.msrb.mxu1 %v1791_v4  ;;  %705 = vmatpush.bf16.msrb.mxu2 %v1919_v14  ;;  %v2326_v4 = vld [vmem:[%s3569_s5 + $0x2c] sm:$0xf0]  ;;  %v1780_v45 = vld [vmem:[%s3569_s5 + $0xd8] sm:$0xf0]  ;;  %v1927_v49 = vor.u32 %v2381_v37, %v1924_v38  ;;  %v1762_v53 = vld [vmem:[%s3569_s5 + $0xa8] sm:$0xf] }
  0x26   :  { %1607 = vmatmul.msk.bf16.vlgmr.msra.gmra.mxu0 %vm117_vm1, %v52_v48  ;;  %v1871_v48 = vor.u32 %v2368_v40, %v1868_v41  ;;  %671 = vmatpush.bf16.msra.mxu3 %v1707_v62  ;;  %v1691_v11 = vor.u32 %v2326_v4, %v1690_v3  ;;  %v2358_v14 = vld [vmem:[%s3569_s5 + $0x12c] sm:$0xf0]  ;;  %v1783_v52 = vor.u32 %v2345_v44, %v1780_v45  ;;  %v2341_v55 = vld [vmem:[%s3569_s5 + $0xac] sm:$0xf]  ;;  %v1764_v57 = vld [vmem:[%s3569_s5 + $0xb8] sm:$0xf0] }
  0x27   :  { %679 = vmatpush.bf16.msrb.mxu0 %v1915_v13  ;;  %v2322_v13 = vld [vmem:[%s3569_s5 + $0xc] sm:$0xf0]  ;;  %v1819_v26 = vor.u32 %v2358_v14, %v1818_v10  ;;  %v1767_v58 = vor.u32 %v2341_v55, %v1764_v57  ;;  %v2377_v61 = vld [vmem:[%s3569_s5 + $0x1cc] sm:$0xf]  ;;  %v1908_v63 = vld [vmem:[%s3569_s5 + $0x1d8] sm:$0xf0] }
  0x28   :  { %v1911_v0 = vor.u32 %v2377_v61, %v1908_v63  ;;  %v1746_v1 = vld [vmem:[%s3569_s5 + $0x88] sm:$0xf]  ;;  %v2337_v3 = vld [vmem:[%s3569_s5 + $0x8c] sm:$0xf]  ;;  %v2335_v14 = vld [vmem:[%s3569_s5 + $0x74] sm:$0xf0] }
  0x29   :  { %693 = vmatpush.bf16.msrb.mxu1 %v1775_v12  ;;  %706 = vmatpush.bf16.msrb.mxu2 %v1903_v25  ;;  %v1674_v12 = vld [vmem:[%s3569_s5] sm:$0xf]  ;;  %v1796_v25 = vld [vmem:[%s3569_s5 + $0xf8] sm:$0xf0]  ;;  %v1890_v7 = vld [vmem:[%s3569_s5 + $0x1a8] sm:$0xf] }
  0x2a   :  { %672 = vmatpush.bf16.msra.mxu3 %v1691_v11  ;;  %v1675_v34 = vor.u32 %v2322_v13, %v1674_v12  ;;  %v1799_v41 = vor.u32 %v2349_v24, %v1796_v25  ;;  %v1892_v11 = vld [vmem:[%s3569_s5 + $0x1b8] sm:$0xf0]  ;;  %v1730_v13 = vld [vmem:[%s3569_s5 + $0x68] sm:$0xf]  ;;  %v2333_v16 = vld [vmem:[%s3569_s5 + $0x6c] sm:$0xf] }
  0x2b   :  { %680 = vmatpush.bf16.msrb.mxu0 %v1899_v21  ;;  %v1794_v21 = vld [vmem:[%s3569_s5 + $0xe8] sm:$0xf]  ;;  %v1731_v15 = vor.u32 %v2335_v14, %v1730_v13  ;;  %v2327_v38 = vld [vmem:[%s3569_s5 + $0x34] sm:$0xf0]  ;;  %v2357_v57 = vld [vmem:[%s3569_s5 + $0x12c] sm:$0xf] }
  0x2c   :  { %v1795_v40 = vor.u32 %v2351_v23, %v1794_v21  ;;  %v2369_v21 = vld [vmem:[%s3569_s5 + $0x18c] sm:$0xf]  ;;  %v1876_v23 = vld [vmem:[%s3569_s5 + $0x198] sm:$0xf0]  ;;  %v1714_v25 = vld [vmem:[%s3569_s5 + $0x48] sm:$0xf] }
  0x2d   :  { %694 = vmatpush.bf16.msrb.mxu1 %v1759_v28  ;;  %707 = vmatpush.bf16.msrb.mxu2 %v1887_v36  ;;  %v1802_v28 = vld [vmem:[%s3569_s5 + $0x100] sm:$0xf]  ;;  %v2383_v36 = vld [vmem:[%s3569_s5 + $0x1f4] sm:$0xf0]  ;;  %v1879_v24 = vor.u32 %v2369_v21, %v1876_v23  ;;  %v1698_v37 = vld [vmem:[%s3569_s5 + $0x28] sm:$0xf] }
  0x2e   :  { %v1803_v46 = vor.u32 %v2354_v29, %v1802_v28  ;;  %673 = vmatpush.bf16.msra.mxu3 %v1675_v34  ;;  %v1716_v29 = vld [vmem:[%s3569_s5 + $0x58] sm:$0xf0]  ;;  %v1826_v55 = vld [vmem:[%s3569_s5 + $0x128] sm:$0xf]  ;;  %v2353_v63 = vld [vmem:[%s3569_s5 + $0x10c] sm:$0xf] }
  0x2f   :  { %681 = vmatpush.bf16.msrb.mxu0 %v1883_v35  ;;  %v1679_v35 = vor.u32 %v2320_v19, %v1676_v20  ;;  %v1874_v19 = vld [vmem:[%s3569_s5 + $0x188] sm:$0xf]  ;;  %v2371_v20 = vld [vmem:[%s3569_s5 + $0x194] sm:$0xf0]  ;;  %v1978_v14 = vld [vmem:[%s3571_s7 + $0x60] sm:$0xf] }
  0x30   :  { %v1810_v61 = vld [vmem:[%s3569_s5 + $0x108] sm:$0xf]  ;;  %v2050_v21 = vld [vmem:[%s3571_s7 + $0xf0] sm:$0xf]  ;;  %v2415_v23 = vld [vmem:[%s3571_s7 + $0xf4] sm:$0xf0] }
  0x31   :  { %695 = vmatpush.bf16.msrb.mxu1 %v1743_v42  ;;  %708 = vmatpush.bf16.msrb.mxu2 %v1871_v48  ;;  %v1778_v42 = vld [vmem:[%s3569_s5 + $0xc8] sm:$0xf]  ;;  %v1923_v48 = vor.u32 %v2383_v36, %v1922_v33  ;;  %v2365_v33 = vld [vmem:[%s3569_s5 + $0x16c] sm:$0xf] }
  0x32   :  { %718 = vmatpush.bf16.msrb.mxu3 %v1795_v40  ;;  %v1779_v51 = vor.u32 %v2347_v43, %v1778_v42  ;;  %v1699_v40 = vor.u32 %v2327_v38, %v1698_v37  ;;  %v1842_v42 = vld [vmem:[%s3569_s5 + $0x148] sm:$0xf]  ;;  %v2363_v43 = vld [vmem:[%s3569_s5 + $0x154] sm:$0xf0] }
  0x33   :  { %682 = vmatpush.bf16.msrb.mxu0 %v1867_v47  ;;  %v1807_v47 = vor.u32 %v2352_v30, %v1804_v32  ;;  %v2367_v32 = vld [vmem:[%s3569_s5 + $0x174] sm:$0xf0]  ;;  %v1843_v45 = vor.u32 %v2363_v43, %v1842_v42  ;;  %v2413_v38 = vld [vmem:[%s3571_s7 + $0xe4] sm:$0xf0]  ;;  %v1962_v42 = vld [vmem:[%s3571_s7 + $0x40] sm:$0xf] }
  0x35   :  { %696 = vmatpush.bf16.msrb.mxu1 %v1727_v54  ;;  %709 = vmatpush.bf16.msrb.mxu2 %v1855_v60  ;;  %v2343_v54 = vld [vmem:[%s3569_s5 + $0xb4] sm:$0xf0] }
  0x36   :  { %719 = vmatpush.bf16.msrb.mxu3 %v1779_v51  ;;  %v1763_v56 = vor.u32 %v2343_v54, %v1762_v53  ;;  %v2379_v60 = vld [vmem:[%s3569_s5 + $0x1d4] sm:$0xf0]  ;;  %v2321_v51 = vld [vmem:[%s3569_s5 + $0xc] sm:$0xf] }
  0x37   :  { %683 = vmatpush.bf16.msrb.mxu0 %v1851_v59  ;;  %v1906_v59 = vld [vmem:[%s3569_s5 + $0x1c8] sm:$0xf] }
  0x38   :  { %v1907_v62 = vor.u32 %v2379_v60, %v1906_v59  ;;  %v1828_v59 = vld [vmem:[%s3569_s5 + $0x138] sm:$0xf0] }
  0x39   :  { %697 = vmatpush.bf16.msrb.mxu1 %v1711_v2  ;;  %710 = vmatpush.bf16.msrb.mxu2 %v1839_v9  ;;  %v2339_v2 = vld [vmem:[%s3569_s5 + $0x94] sm:$0xf0]  ;;  %v2373_v9 = vld [vmem:[%s3569_s5 + $0x1ac] sm:$0xf]  ;;  %v1831_v60 = vor.u32 %v2357_v57, %v1828_v59 }
  0x3a   :  { %720 = vmatpush.bf16.msrb.mxu3 %v1763_v56  ;;  %v1747_v4 = vor.u32 %v2339_v2, %v1746_v1  ;;  %v1895_v12 = vor.u32 %v2373_v9, %v1892_v11  ;;  %v2359_v56 = vld [vmem:[%s3569_s5 + $0x134] sm:$0xf0]  ;;  %v1812_v1 = vld [vmem:[%s3569_s5 + $0x118] sm:$0xf0]  ;;  %v2114_v11 = vld [vmem:[%s3571_s7 + $0x170] sm:$0xf] }
  0x3b   :  { %684 = vmatpush.bf16.msrb.mxu0 %v1835_v8  ;;  %v2375_v8 = vld [vmem:[%s3569_s5 + $0x1b4] sm:$0xf0]  ;;  %v1815_v2 = vor.u32 %v2353_v63, %v1812_v1  ;;  %v1946_v63 = vld [vmem:[%s3571_s7 + $0x20] sm:$0xf] }
  0x3c   :  { %v1891_v10 = vor.u32 %v2375_v8, %v1890_v7  ;;  %v1986_v7 = vld [vmem:[%s3571_s7 + $0x70] sm:$0xf]  ;;  %v2399_v8 = vld [vmem:[%s3571_s7 + $0x74] sm:$0xf0] }
  0x3d   :  { %698 = vmatpush.bf16.msrb.mxu1 %v1695_v18  ;;  %711 = vmatpush.bf16.msrb.mxu2 %v1823_v27  ;;  %v2329_v27 = vld [vmem:[%s3569_s5 + $0x4c] sm:$0xf]  ;;  %v1987_v13 = vor.u32 %v2399_v8, %v1986_v7  ;;  %v2391_v57 = vld [vmem:[%s3571_s7 + $0x34] sm:$0xf0]  ;;  %v2010_v8 = vld [vmem:[%s3571_s7 + $0xa0] sm:$0xf] }
  0x3e   :  { %721 = vmatpush.bf16.msrb.mxu3 %v1747_v4  ;;  %v1719_v30 = vor.u32 %v2329_v27, %v1716_v29  ;;  %v2395_v29 = vld [vmem:[%s3571_s7 + $0x54] sm:$0xf0] }
  0x3f   :  { %685 = vmatpush.bf16.msrb.mxu0 %v1819_v26  ;;  %v2331_v26 = vld [vmem:[%s3569_s5 + $0x54] sm:$0xf0] }
  0x40   :  { %v1715_v28 = vor.u32 %v2331_v26, %v1714_v25  ;;  %v2447_v25 = vld [vmem:[%s3571_s7 + $0x1f4] sm:$0xf0] }
  0x41   :  { %699 = vmatpush.bf16.msrb.mxu1 %v1679_v35  ;;  %712 = vmatpush.bf16.msrb.mxu2 %v1807_v47  ;;  %v1860_v35 = vld [vmem:[%s3569_s5 + $0x178] sm:$0xf0] }
  0x42   :  { %722 = vmatpush.bf16.msrb.mxu3 %v1731_v15  ;;  %v1863_v36 = vor.u32 %v2365_v33, %v1860_v35  ;;  %v1844_v47 = vld [vmem:[%s3569_s5 + $0x158] sm:$0xf0]  ;;  %v2427_v33 = vld [vmem:[%s3571_s7 + $0x154] sm:$0xf0]  ;;  %v2042_v35 = vld [vmem:[%s3571_s7 + $0xe0] sm:$0xf] }
  0x43   :  { %686 = vmatpush.bf16.msrb.mxu0 %v1803_v46  ;;  %v2361_v46 = vld [vmem:[%s3569_s5 + $0x14c] sm:$0xf] }
  0x46   :  { %723 = vmatpush.bf16.msrb.mxu3 %v1715_v28  ;;  %v1970_v28 = vld [vmem:[%s3571_s7 + $0x50] sm:$0xf] }
  0x47   :  { %731 = vmatpush.bf16.msra.mxu0 %v1923_v48  ;;  %v1682_v48 = vld [vmem:[%s3569_s5 + $0x8] sm:$0xf] }
  0x4a   :  { %724 = vmatpush.bf16.msrb.mxu3 %v1699_v40  ;;  %v2445_v40 = vld [vmem:[%s3571_s7 + $0x1e4] sm:$0xf0] }
  0x4b   :  { %732 = vmatpush.bf16.msra.mxu0 %v1907_v62  ;;  %v2355_v62 = vld [vmem:[%s3569_s5 + $0x114] sm:$0xf0] }
  0x4f   :  { %733 = vmatpush.bf16.msra.mxu0 %v1891_v10 }
  0xa3   :  { %v134_v17 = vpop.f32.mrf.mxu0 }
  0xa4   :  { %v135_v22 = vadd.f32 %v2476_v5, %v134_v17  ;;  %v1748_v5 = vld [vmem:[%s3569_s5 + $0x98] sm:$0xf0] }
  0xa5   :  { %v1751_v6 = vor.u32 %v2337_v3, %v1748_v5  ;;  %v1732_v17 = vld [vmem:[%s3569_s5 + $0x78] sm:$0xf0]  ;;  %v156_v3 = vld [vmem:[%s3570_s4] sm:$0x3] }
  0xa6   :  { %v138_v31 = vmax.f32 %v135_v22, 0.0  ;;  %v1735_v18 = vor.u32 %v2333_v16, %v1732_v17  ;;  %v1875_v22 = vor.u32 %v2371_v20, %v1874_v19  ;;  %v158_v4 = vperm.slane %v156_v3, 0  ;;  %v2397_v17 = vld [vmem:[%s3571_s7 + $0x64] sm:$0xf0] }
  0xa7   :  { %v159_v10 = vperm.slane %v156_v3, 1  ;;  %v2429_v19 = vld [vmem:[%s3571_s7 + $0x164] sm:$0xf0]  ;;  %v1979_v27 = vor.u32 %v2397_v17, %v1978_v14  ;;  %v2407_v3 = vld [vmem:[%s3571_s7 + $0xb4] sm:$0xf0] }
  0xa8   :  { %v139_v39 = vpack.c.bf16 %v138_v31, %v138_v31  ;;  %734 = vmatpush.bf16.msra.mxu0 %v1875_v22  ;;  %v1858_v31 = vld [vmem:[%s3569_s5 + $0x168] sm:$0xf]  ;;  %v2002_v14 = vld [vmem:[%s3571_s7 + $0x90] sm:$0xf] }
  0xa9   :  { %v1859_v34 = vor.u32 %v2367_v32, %v1858_v31  ;;  %v2098_v32 = vld [vmem:[%s3571_s7 + $0x150] sm:$0xf] }
  0xaa   :  { %250 = vmatmul.bf16.vlgmr.msra.gmra.mxu1 %v139_v39  ;;  %263 = vmatmul.bf16.vlgmr.msra.gmra.mxu2 %v139_v39  ;;  %v2325_v39 = vld [vmem:[%s3569_s5 + $0x2c] sm:$0xf]  ;;  %v2099_v43 = vor.u32 %v2427_v33, %v2098_v32  ;;  %v2414_v32 = vld [vmem:[%s3571_s7 + $0xf4] sm:$0xf] }
  0xab   :  { %v136_v50 = vpop.f32.mrf.mxu0  ;;  %744 = vmatpush.bf16.msra.mxu1 %v1799_v41  ;;  %757 = vmatpush.bf16.msra.mxu2 %v1927_v49  ;;  %v1700_v41 = vld [vmem:[%s3569_s5 + $0x38] sm:$0xf0]  ;;  %v1847_v49 = vor.u32 %v2361_v46, %v1844_v47  ;;  %v2425_v46 = vld [vmem:[%s3571_s7 + $0x144] sm:$0xf0] }
  0xac   :  { %735 = vmatpush.bf16.msra.mxu0 %v1859_v34  ;;  %v1703_v44 = vor.u32 %v2325_v39, %v1700_v41  ;;  %v2323_v50 = vld [vmem:[%s3569_s5 + $0x14] sm:$0xf0]  ;;  %v2051_v34 = vor.u32 %v2415_v23, %v2050_v21  ;;  %v2170_v39 = vld [vmem:[%s3571_s7 + $0x1e0] sm:$0xf]  ;;  %v1971_v41 = vor.u32 %v2395_v29, %v1970_v28  ;;  %v2082_v23 = vld [vmem:[%s3571_s7 + $0x130] sm:$0xf] }
  0xad   :  { %v1683_v53 = vor.u32 %v2323_v50, %v1682_v48  ;;  %v2043_v48 = vor.u32 %v2413_v38, %v2042_v35  ;;  %v2171_v50 = vor.u32 %v2445_v40, %v2170_v39  ;;  %v1994_v21 = vld [vmem:[%s3571_s7 + $0x80] sm:$0xf]  ;;  %v2146_v38 = vld [vmem:[%s3571_s7 + $0x1b0] sm:$0xf]  ;;  %v2439_v40 = vld [vmem:[%s3571_s7 + $0x1b4] sm:$0xf0] }
  0xaf   :  { %745 = vmatpush.bf16.msra.mxu1 %v1783_v52  ;;  %758 = vmatpush.bf16.msra.mxu2 %v1911_v0  ;;  %v1684_v52 = vld [vmem:[%s3569_s5 + $0x18] sm:$0xf0]  ;;  %v1811_v0 = vor.u32 %v2355_v62, %v1810_v61  ;;  %v2409_v61 = vld [vmem:[%s3571_s7 + $0xc4] sm:$0xf0] }
  0xb0   :  { %v1687_v54 = vor.u32 %v2321_v51, %v1684_v52  ;;  %736 = vmatpush.bf16.msra.mxu0 %v1843_v45  ;;  %725 = vmatpush.bf16.msrb.mxu3 %v1683_v53  ;;  %v2090_v45 = vld [vmem:[%s3571_s7 + $0x140] sm:$0xf]  ;;  %v2411_v51 = vld [vmem:[%s3571_s7 + $0xd4] sm:$0xf0]  ;;  %v2162_v52 = vld [vmem:[%s3571_s7 + $0x1d0] sm:$0xf] }
  0xb1   :  { %v2443_v53 = vld [vmem:[%s3571_s7 + $0x1d4] sm:$0xf0] }
  0xb2   :  { %v2163_v59 = vor.u32 %v2443_v53, %v2162_v52  ;;  %v2437_v52 = vld [vmem:[%s3571_s7 + $0x1a4] sm:$0xf0]  ;;  %v2392_v53 = vld [vmem:[%s3571_s7 + $0x44] sm:$0xf] }
  0xb3   :  { %746 = vmatpush.bf16.msra.mxu1 %v1767_v58  ;;  %759 = vmatpush.bf16.msra.mxu2 %v1895_v12  ;;  %v1827_v58 = vor.u32 %v2359_v56, %v1826_v55  ;;  %v2431_v12 = vld [vmem:[%s3571_s7 + $0x174] sm:$0xf0]  ;;  %v2091_v55 = vor.u32 %v2425_v46, %v2090_v45  ;;  %v1954_v56 = vld [vmem:[%s3571_s7 + $0x30] sm:$0xf]  ;;  %v2412_v45 = vld [vmem:[%s3571_s7 + $0xe4] sm:$0xf] }
  0xb4   :  { %v2115_v15 = vor.u32 %v2431_v12, %v2114_v11  ;;  %v1955_v62 = vor.u32 %v2391_v57, %v1954_v56  ;;  %v1930_v11 = vld [vmem:[%s3571_s7] sm:$0xf]  ;;  %v2385_v12 = vld [vmem:[%s3571_s7 + $0x4] sm:$0xf0]  ;;  %v2044_v46 = vld [vmem:[%s3571_s7 + $0xe8] sm:$0xf0] }
  0xb5   :  { %737 = vmatpush.bf16.msra.mxu0 %v1827_v58  ;;  %v2410_v57 = vld [vmem:[%s3571_s7 + $0xd4] sm:$0xf] }
  0xb7   :  { %747 = vmatpush.bf16.msra.mxu1 %v1751_v6  ;;  %760 = vmatpush.bf16.msra.mxu2 %v1879_v24  ;;  %v2178_v24 = vld [vmem:[%s3571_s7 + $0x1f0] sm:$0xf] }
  0xb9   :  { %738 = vmatpush.bf16.msra.mxu0 %v1811_v0  ;;  %v2389_v0 = vld [vmem:[%s3571_s7 + $0x24] sm:$0xf0] }
  0xbb   :  { %748 = vmatpush.bf16.msra.mxu1 %v1735_v18  ;;  %761 = vmatpush.bf16.msra.mxu2 %v1863_v36  ;;  %v2106_v18 = vld [vmem:[%s3571_s7 + $0x160] sm:$0xf]  ;;  %v2179_v36 = vor.u32 %v2447_v25, %v2178_v24  ;;  %v2423_v25 = vld [vmem:[%s3571_s7 + $0x134] sm:$0xf0] }
  0xbc   :  { %v2083_v28 = vor.u32 %v2423_v25, %v2082_v23  ;;  %v2446_v23 = vld [vmem:[%s3571_s7 + $0x1f4] sm:$0xf] }
  0xbf   :  { %749 = vmatpush.bf16.msra.mxu1 %v1719_v30  ;;  %762 = vmatpush.bf16.msra.mxu2 %v1847_v49  ;;  %v2107_v30 = vor.u32 %v2429_v19, %v2106_v18  ;;  %v2034_v49 = vld [vmem:[%s3571_s7 + $0xd0] sm:$0xf]  ;;  %v2398_v18 = vld [vmem:[%s3571_s7 + $0x74] sm:$0xf]  ;;  %v1988_v19 = vld [vmem:[%s3571_s7 + $0x78] sm:$0xf0] }
  0xc0   :  { %v2035_v58 = vor.u32 %v2411_v51, %v2034_v49  ;;  %v2419_v49 = vld [vmem:[%s3571_s7 + $0x114] sm:$0xf0] }
  0xc3   :  { %750 = vmatpush.bf16.msra.mxu1 %v1703_v44  ;;  %763 = vmatpush.bf16.msra.mxu2 %v1831_v60  ;;  %v2393_v44 = vld [vmem:[%s3571_s7 + $0x44] sm:$0xf0]  ;;  %v2026_v60 = vld [vmem:[%s3571_s7 + $0xc0] sm:$0xf] }
  0xc4   :  { %v2027_v1 = vor.u32 %v2409_v61, %v2026_v60  ;;  %v2058_v60 = vld [vmem:[%s3571_s7 + $0x100] sm:$0xf]  ;;  %v2417_v61 = vld [vmem:[%s3571_s7 + $0x104] sm:$0xf0] }
  0xc7   :  { %751 = vmatpush.bf16.msra.mxu1 %v1687_v54  ;;  %764 = vmatpush.bf16.msra.mxu2 %v1815_v2  ;;  %v1963_v54 = vor.u32 %v2393_v44, %v1962_v42  ;;  %v2018_v2 = vld [vmem:[%s3571_s7 + $0xb0] sm:$0xf]  ;;  %v1972_v42 = vld [vmem:[%s3571_s7 + $0x58] sm:$0xf0] }
  0xc8   :  { %v2019_v7 = vor.u32 %v2407_v3, %v2018_v2  ;;  %v1956_v2 = vld [vmem:[%s3571_s7 + $0x38] sm:$0xf0] }
 0x127   :  { %v251_v5 = vpop.f32.mrf.mxu1 }
 0x128   :  { %v252_v6 = vadd.f32 %v251_v5, %v158_v4  ;;  %v1947_v4 = vor.u32 %v2389_v0, %v1946_v63  ;;  %v1938_v5 = vld [vmem:[%s3571_s7 + $0x10] sm:$0xf]  ;;  %v2059_v63 = vor.u32 %v2417_v61, %v2058_v60  ;;  %v2435_v0 = vld [vmem:[%s3571_s7 + $0x194] sm:$0xf0]  ;;  %v2420_v60 = vld [vmem:[%s3571_s7 + $0x124] sm:$0xf] }
 0x129   :  { %v2076_v61 = vld [vmem:[%s3571_s7 + $0x128] sm:$0xf0] }
 0x12a   :  { %v268_v9 = vmax.f32 %v252_v6, 0.0  ;;  %v2387_v6 = vld [vmem:[%s3571_s7 + $0x14] sm:$0xf0] }
 0x12c   :  { %v3088_v16 = vpack.c.bf16 %v268_v9, %v268_v9  ;;  %v2405_v9 = vld [vmem:[%s3571_s7 + $0xa4] sm:$0xf0] }
 0x12d   :  { %v264_v20 = vpop.f32.mrf.mxu2 }
 0x12e   :  { %v265_v22 = vadd.f32 %v264_v20, %v159_v10  ;;  %674 = vmatmul.bf16.vlgmr.msra.gmra.mxu3 %v3088_v16  ;;  %700 = vmatmul.bf16.vlgmr.msrb.gmra.mxu1 %v3088_v16  ;;  %v1939_v10 = vor.u32 %v2387_v6, %v1938_v5  ;;  %v1991_v20 = vor.u32 %v2398_v18, %v1988_v19  ;;  %v2408_v5 = vld [vmem:[%s3571_s7 + $0xc4] sm:$0xf]  ;;  %v2028_v6 = vld [vmem:[%s3571_s7 + $0xc8] sm:$0xf0]  ;;  %v2020_v18 = vld [vmem:[%s3571_s7 + $0xb8] sm:$0xf0] }
 0x12f   :  { %v253_v26 = vpop.f32.mrf.mxu1  ;;  %1168 = vmatpush.bf16.msra.mxu3 %v1987_v13  ;;  %1194 = vmatpush.bf16.msrb.mxu1 %v2115_v15  ;;  %v2011_v13 = vor.u32 %v2405_v9, %v2010_v8  ;;  %v2403_v15 = vld [vmem:[%s3571_s7 + $0x94] sm:$0xf0]  ;;  %v2031_v8 = vor.u32 %v2408_v5, %v2028_v6  ;;  %v2116_v9 = vld [vmem:[%s3571_s7 + $0x178] sm:$0xf0]  ;;  %v2428_v19 = vld [vmem:[%s3571_s7 + $0x164] sm:$0xf] }
 0x130   :  { %v269_v31 = vmax.f32 %v265_v22, 0.0  ;;  %v2003_v17 = vor.u32 %v2403_v15, %v2002_v14  ;;  %v2401_v22 = vld [vmem:[%s3571_s7 + $0x84] sm:$0xf0]  ;;  %v2154_v26 = vld [vmem:[%s3571_s7 + $0x1c0] sm:$0xf] }
 0x131   :  { %v1995_v24 = vor.u32 %v2401_v22, %v1994_v21  ;;  %v2388_v14 = vld [vmem:[%s3571_s7 + $0x24] sm:$0xf]  ;;  %v1948_v15 = vld [vmem:[%s3571_s7 + $0x28] sm:$0xf0]  ;;  %v2068_v5 = vld [vmem:[%s3571_s7 + $0x118] sm:$0xf0] }
 0x132   :  { %v271_v37 = vpack.c.bf16 %v269_v31, %v269_v31  ;;  %v1980_v31 = vld [vmem:[%s3571_s7 + $0x68] sm:$0xf0]  ;;  %v2436_v6 = vld [vmem:[%s3571_s7 + $0x1a4] sm:$0xf] }
 0x133   :  { %1169 = vmatpush.bf16.msra.mxu3 %v1979_v27  ;;  %1195 = vmatpush.bf16.msrb.mxu1 %v2107_v30  ;;  %v2441_v27 = vld [vmem:[%s3571_s7 + $0x1c4] sm:$0xf0]  ;;  %v2396_v30 = vld [vmem:[%s3571_s7 + $0x64] sm:$0xf] }
 0x134   :  { %687 = vmatmul.bf16.vlgmr.msrb.gmra.mxu0 %v271_v37  ;;  %713 = vmatmul.bf16.vlgmr.msrb.gmra.mxu2 %v271_v37  ;;  %v2155_v29 = vor.u32 %v2441_v27, %v2154_v26  ;;  %v1983_v33 = vor.u32 %v2396_v30, %v1980_v31  ;;  %v2386_v26 = vld [vmem:[%s3571_s7 + $0x14] sm:$0xf]  ;;  %v1940_v27 = vld [vmem:[%s3571_s7 + $0x18] sm:$0xf0]  ;;  %v2012_v30 = vld [vmem:[%s3571_s7 + $0xa8] sm:$0xf0] }
 0x135   :  { %v266_v47 = vpop.f32.mrf.mxu2  ;;  %1181 = vmatpush.bf16.msrb.mxu0 %v2051_v34  ;;  %1207 = vmatpush.bf16.msrb.mxu2 %v2179_v36  ;;  %v2052_v34 = vld [vmem:[%s3571_s7 + $0xf8] sm:$0xf0]  ;;  %v2074_v36 = vld [vmem:[%s3571_s7 + $0x120] sm:$0xf]  ;;  %v2426_v31 = vld [vmem:[%s3571_s7 + $0x154] sm:$0xf] }
 0x136   :  { %v2055_v35 = vor.u32 %v2414_v32, %v2052_v34  ;;  %v2047_v47 = vor.u32 %v2412_v45, %v2044_v46  ;;  %v2100_v32 = vld [vmem:[%s3571_s7 + $0x158] sm:$0xf0] }
 0x137   :  { %1170 = vmatpush.bf16.msra.mxu3 %v1971_v41  ;;  %1196 = vmatpush.bf16.msrb.mxu1 %v2099_v43  ;;  %v2394_v41 = vld [vmem:[%s3571_s7 + $0x54] sm:$0xf]  ;;  %v2147_v43 = vor.u32 %v2439_v40, %v2146_v38  ;;  %v2103_v34 = vor.u32 %v2426_v31, %v2100_v32  ;;  %v2384_v38 = vld [vmem:[%s3571_s7 + $0x4] sm:$0xf] }
 0x138   :  { %v1975_v44 = vor.u32 %v2394_v41, %v1972_v42  ;;  %v2402_v40 = vld [vmem:[%s3571_s7 + $0x94] sm:$0xf]  ;;  %v2004_v42 = vld [vmem:[%s3571_s7 + $0x98] sm:$0xf0] }
 0x139   :  { %1182 = vmatpush.bf16.msrb.mxu0 %v2043_v48  ;;  %1208 = vmatpush.bf16.msrb.mxu2 %v2171_v50  ;;  %v2066_v48 = vld [vmem:[%s3571_s7 + $0x110] sm:$0xf]  ;;  %v2138_v50 = vld [vmem:[%s3571_s7 + $0x1a0] sm:$0xf]  ;;  %v2007_v45 = vor.u32 %v2402_v40, %v2004_v42 }
 0x13a   :  { %v2067_v51 = vor.u32 %v2419_v49, %v2066_v48  ;;  %v2164_v48 = vld [vmem:[%s3571_s7 + $0x1d8] sm:$0xf0] }
 0x13b   :  { %1171 = vmatpush.bf16.msra.mxu3 %v1963_v54  ;;  %1197 = vmatpush.bf16.msrb.mxu1 %v2091_v55  ;;  %v1964_v54 = vld [vmem:[%s3571_s7 + $0x48] sm:$0xf0]  ;;  %v2139_v55 = vor.u32 %v2437_v52, %v2138_v50  ;;  %v2400_v50 = vld [vmem:[%s3571_s7 + $0x84] sm:$0xf]  ;;  %v2422_v52 = vld [vmem:[%s3571_s7 + $0x134] sm:$0xf] }
 0x13c   :  { %v1967_v56 = vor.u32 %v2392_v53, %v1964_v54  ;;  %v2084_v54 = vld [vmem:[%s3571_s7 + $0x138] sm:$0xf0] }
 0x13d   :  { %1183 = vmatpush.bf16.msrb.mxu0 %v2035_v58  ;;  %1209 = vmatpush.bf16.msrb.mxu2 %v2163_v59  ;;  %v2036_v58 = vld [vmem:[%s3571_s7 + $0xd8] sm:$0xf0] }
 0x13e   :  { %726 = vmatmul.bf16.vlgmr.msrb.gmra.mxu3 %v3088_v16  ;;  %752 = vmatmul.bf16.vlgmr.msra.gmra.mxu1 %v3088_v16  ;;  %v1931_v16 = vor.u32 %v2385_v12, %v1930_v11  ;;  %v2039_v59 = vor.u32 %v2410_v57, %v2036_v58  ;;  %v2122_v11 = vld [vmem:[%s3571_s7 + $0x180] sm:$0xf]  ;;  %v2433_v12 = vld [vmem:[%s3571_s7 + $0x184] sm:$0xf0]  ;;  %v2087_v57 = vor.u32 %v2422_v52, %v2084_v54  ;;  %v2454_v54 = vld [vmem:[%s3573_s9 + $0x30] sm:$0xff] }
 0x13f   :  { %1172 = vmatpush.bf16.msra.mxu3 %v1955_v62  ;;  %1198 = vmatpush.bf16.msrb.mxu1 %v2083_v28  ;;  %v2130_v62 = vld [vmem:[%s3571_s7 + $0x190] sm:$0xf]  ;;  %v2404_v28 = vld [vmem:[%s3571_s7 + $0xa4] sm:$0xf] }
 0x140   :  { %v2131_v3 = vor.u32 %v2435_v0, %v2130_v62  ;;  %v2438_v62 = vld [vmem:[%s3571_s7 + $0x1b4] sm:$0xf]  ;;  %v2079_v0 = vor.u32 %v2420_v60, %v2076_v61  ;;  %v2449_v61 = vld [vmem:[%s3573_s9 + $0x8] sm:$0xff] }
 0x141   :  { %1184 = vmatpush.bf16.msrb.mxu0 %v2027_v1  ;;  %1210 = vmatpush.bf16.msrb.mxu2 %v2155_v29  ;;  %v2390_v1 = vld [vmem:[%s3571_s7 + $0x34] sm:$0xf]  ;;  %v1943_v29 = vor.u32 %v2386_v26, %v1940_v27  ;;  %v2432_v27 = vld [vmem:[%s3571_s7 + $0x184] sm:$0xf] }
 0x142   :  { %v2462_v60 = vld [vmem:[%s3573_s9 + $0x70] sm:$0xff] }
 0x143   :  { %1173 = vmatpush.bf16.msra.mxu3 %v1947_v4  ;;  %v1959_v4 = vor.u32 %v2390_v1, %v1956_v2  ;;  %v2148_v1 = vld [vmem:[%s3571_s7 + $0x1b8] sm:$0xf0] }
 0x144   :  { %739 = vmatmul.bf16.vlgmr.msra.gmra.mxu0 %v271_v37  ;;  %765 = vmatmul.bf16.vlgmr.msra.gmra.mxu2 %v271_v37  ;;  %v2421_v37 = vld [vmem:[%s3571_s7 + $0x124] sm:$0xf0] }
 0x145   :  { %1185 = vmatpush.bf16.msrb.mxu0 %v2019_v7  ;;  %v2075_v39 = vor.u32 %v2421_v37, %v2074_v36  ;;  %1211 = vmatpush.bf16.msrb.mxu2 %v2147_v43  ;;  %v2430_v7 = vld [vmem:[%s3571_s7 + $0x174] sm:$0xf]  ;;  %v2172_v36 = vld [vmem:[%s3571_s7 + $0x1e8] sm:$0xf0]  ;;  %v2424_v43 = vld [vmem:[%s3571_s7 + $0x144] sm:$0xf] }
 0x147   :  { %1174 = vmatpush.bf16.msra.mxu3 %v1939_v10  ;;  %1199 = vmatpush.bf16.msrb.mxu1 %v2075_v39  ;;  %v2119_v10 = vor.u32 %v2430_v7, %v2116_v9  ;;  %v1932_v39 = vld [vmem:[%s3571_s7 + $0x8] sm:$0xf0] }
 0x148   :  { %v1935_v41 = vor.u32 %v2384_v38, %v1932_v39  ;;  %v2140_v7 = vld [vmem:[%s3571_s7 + $0x1a8] sm:$0xf0] }
 0x149   :  { %1186 = vmatpush.bf16.msrb.mxu0 %v2011_v13  ;;  %1212 = vmatpush.bf16.msrb.mxu2 %v2139_v55  ;;  %v2123_v13 = vor.u32 %v2433_v12, %v2122_v11  ;;  %v2440_v55 = vld [vmem:[%s3571_s7 + $0x1c4] sm:$0xf] }
 0x14b   :  { %1175 = vmatpush.bf16.msra.mxu3 %v1931_v16  ;;  %1200 = vmatpush.bf16.msrb.mxu1 %v2067_v51  ;;  %v2406_v16 = vld [vmem:[%s3571_s7 + $0xb4] sm:$0xf]  ;;  %v1996_v51 = vld [vmem:[%s3571_s7 + $0x88] sm:$0xf0] }
 0x14c   :  { %v2023_v21 = vor.u32 %v2406_v16, %v2020_v18  ;;  %v1999_v53 = vor.u32 %v2400_v50, %v1996_v51  ;;  %v2132_v18 = vld [vmem:[%s3571_s7 + $0x198] sm:$0xf0] }
 0x14d   :  { %1187 = vmatpush.bf16.msrb.mxu0 %v2003_v17  ;;  %1213 = vmatpush.bf16.msrb.mxu2 %v2131_v3  ;;  %v1951_v17 = vor.u32 %v2388_v14, %v1948_v15  ;;  %v2151_v3 = vor.u32 %v2438_v62, %v2148_v1  ;;  %v2416_v14 = vld [vmem:[%s3571_s7 + $0x104] sm:$0xf]  ;;  %v2060_v15 = vld [vmem:[%s3571_s7 + $0x108] sm:$0xf0]  ;;  %v2459_v1 = vld [vmem:[%s3573_s9 + $0x58] sm:$0xff] }
 0x14e   :  { %v2461_v62 = vld [vmem:[%s3573_s9 + $0x68] sm:$0xff] }
 0x14f   :  { %1220 = vmatpush.bf16.msrb.mxu3 %v1991_v20  ;;  %1201 = vmatpush.bf16.msrb.mxu1 %v2059_v63  ;;  %v2108_v20 = vld [vmem:[%s3571_s7 + $0x168] sm:$0xf0]  ;;  %v336_v63 = vld [vmem:[%s3572_s6] sm:$0xf] }
 0x150   :  { %v2111_v22 = vor.u32 %v2428_v19, %v2108_v20  ;;  %v338_v2 = vperm.slane %v336_v63, 0  ;;  %v339_v11 = vperm.slane %v336_v63, 1  ;;  %v2063_v20 = vor.u32 %v2416_v14, %v2060_v15  ;;  %v2470_v15 = vld [vmem:[%s3576_s11 + $0x30] sm:$0xff] }
 0x151   :  { %1188 = vmatpush.bf16.msrb.mxu0 %v1995_v24  ;;  %v2180_v24 = vld [vmem:[%s3571_s7 + $0x1f8] sm:$0xf0]  ;;  %1214 = vmatpush.bf16.msrb.mxu2 %v2123_v13  ;;  %v2143_v13 = vor.u32 %v2436_v6, %v2140_v7  ;;  %v341_v40 = vperm.slane %v336_v63, 3  ;;  %v842_v6 = vld [vmem:[%s3575_s8] sm:$0x3] }
 0x152   :  { %v2183_v25 = vor.u32 %v2446_v23, %v2180_v24 }
 0x153   :  { %1221 = vmatpush.bf16.msrb.mxu3 %v1983_v33  ;;  %1246 = vmatpush.bf16.msra.mxu1 %v2119_v10  ;;  %v2015_v33 = vor.u32 %v2404_v28, %v2012_v30  ;;  %v2124_v28 = vld [vmem:[%s3571_s7 + $0x188] sm:$0xf0] }
 0x154   :  { %v2127_v32 = vor.u32 %v2432_v27, %v2124_v28  ;;  %v845_v27 = vperm.slane %v842_v6, 1 }
 0x155   :  { %1233 = vmatpush.bf16.msra.mxu0 %v2055_v35  ;;  %1259 = vmatpush.bf16.msra.mxu2 %v2183_v25  ;;  %v2444_v35 = vld [vmem:[%s3571_s7 + $0x1e4] sm:$0xf] }
 0x156   :  { %v2175_v37 = vor.u32 %v2444_v35, %v2172_v36  ;;  %v340_v35 = vperm.slane %v336_v63, 2  ;;  %v2455_v36 = vld [vmem:[%s3573_s9 + $0x38] sm:$0xff]  ;;  %v2448_v63 = vld [vmem:[%s3573_s9] sm:$0xff] }
 0x157   :  { %1222 = vmatpush.bf16.msrb.mxu3 %v1975_v44  ;;  %1247 = vmatpush.bf16.msra.mxu1 %v2111_v22  ;;  %v2092_v44 = vld [vmem:[%s3571_s7 + $0x148] sm:$0xf0] }
 0x158   :  { %v2095_v46 = vor.u32 %v2424_v43, %v2092_v44 }
 0x159   :  { %1234 = vmatpush.bf16.msra.mxu0 %v2047_v47  ;;  %1260 = vmatpush.bf16.msra.mxu2 %v2175_v37  ;;  %v2442_v47 = vld [vmem:[%s3571_s7 + $0x1d4] sm:$0xf] }
 0x15a   :  { %v2167_v49 = vor.u32 %v2442_v47, %v2164_v48 }
 0x15b   :  { %1223 = vmatpush.bf16.msrb.mxu3 %v1967_v56  ;;  %1248 = vmatpush.bf16.msra.mxu1 %v2103_v34  ;;  %v2156_v56 = vld [vmem:[%s3571_s7 + $0x1c8] sm:$0xf0] }
 0x15c   :  { %v2159_v58 = vor.u32 %v2440_v55, %v2156_v56  ;;  %v2453_v55 = vld [vmem:[%s3573_s9 + $0x28] sm:$0xff]  ;;  %v2452_v56 = vld [vmem:[%s3573_s9 + $0x20] sm:$0xff] }
 0x15d   :  { %1235 = vmatpush.bf16.msra.mxu0 %v2039_v59  ;;  %1261 = vmatpush.bf16.msra.mxu2 %v2167_v49 }
 0x15f   :  { %1224 = vmatpush.bf16.msrb.mxu3 %v1959_v4  ;;  %1249 = vmatpush.bf16.msra.mxu1 %v2095_v46  ;;  %v2418_v4 = vld [vmem:[%s3571_s7 + $0x114] sm:$0xf] }
 0x160   :  { %v2071_v10 = vor.u32 %v2418_v4, %v2068_v5  ;;  %v2457_v5 = vld [vmem:[%s3573_s9 + $0x48] sm:$0xff] }
 0x161   :  { %1236 = vmatpush.bf16.msra.mxu0 %v2031_v8  ;;  %1262 = vmatpush.bf16.msra.mxu2 %v2159_v58  ;;  %v2463_v58 = vld [vmem:[%s3573_s9 + $0x78] sm:$0xff] }
 0x163   :  { %1225 = vmatpush.bf16.msrb.mxu3 %v1951_v17  ;;  %1250 = vmatpush.bf16.msra.mxu1 %v2087_v57  ;;  %v2434_v17 = vld [vmem:[%s3571_s7 + $0x194] sm:$0xf]  ;;  %v2451_v57 = vld [vmem:[%s3573_s9 + $0x18] sm:$0xff] }
 0x164   :  { %v2135_v23 = vor.u32 %v2434_v17, %v2132_v18 }
 0x165   :  { %1237 = vmatpush.bf16.msra.mxu0 %v2023_v21  ;;  %1263 = vmatpush.bf16.msra.mxu2 %v2151_v3 }
 0x167   :  { %1226 = vmatpush.bf16.msrb.mxu3 %v1943_v29  ;;  %1251 = vmatpush.bf16.msra.mxu1 %v2079_v0  ;;  %v2460_v0 = vld [vmem:[%s3573_s9 + $0x60] sm:$0xff] }
 0x169   :  { %1238 = vmatpush.bf16.msra.mxu0 %v2015_v33  ;;  %1264 = vmatpush.bf16.msra.mxu2 %v2143_v13 }
 0x16b   :  { %1227 = vmatpush.bf16.msrb.mxu3 %v1935_v41  ;;  %1252 = vmatpush.bf16.msra.mxu1 %v2071_v10  ;;  %v844_v10 = vperm.slane %v842_v6, 0 }
 0x16d   :  { %1239 = vmatpush.bf16.msra.mxu0 %v2007_v45  ;;  %1265 = vmatpush.bf16.msra.mxu2 %v2135_v23 }
 0x16f   :  { %1253 = vmatpush.bf16.msra.mxu1 %v2063_v20 }
 0x171   :  { %1240 = vmatpush.bf16.msra.mxu0 %v1999_v53  ;;  %1266 = vmatpush.bf16.msra.mxu2 %v2127_v32 }
 0x1ab   :  { %v701_v59 = vpop.f32.mrf.mxu1 }
 0x1ac   :  { %v702_v21 = vadd.f32 %v701_v59, %v339_v11  ;;  %v2450_v59 = vld [vmem:[%s3573_s9 + $0x10] sm:$0xff] }
 0x1b1   :  { %v675_v8 = vpop.f32.mrf.mxu3  ;;  %v688_v9 = vpop.f32.mrf.mxu0 }
 0x1b2   :  { %v676_v12 = vadd.f32 %v675_v8, %v338_v2  ;;  %v2458_v2 = vld [vmem:[%s3573_s9 + $0x50] sm:$0xff]  ;;  %v2456_v8 = vld [vmem:[%s3573_s9 + $0x40] sm:$0xff] }
 0x1b3   :  { %v703_v16 = vpop.f32.mrf.mxu1 }
 0x1b4   :  { %v689_v19 = vadd.f32 %v688_v9, %v676_v12  ;;  %v2471_v12 = vld [vmem:[%s3576_s11 + $0x38] sm:$0xff] }
 0x1b6   :  { %v770_v22 = vmax.f32 %v689_v19, 0.0  ;;  %v2469_v19 = vld [vmem:[%s3576_s11 + $0x28] sm:$0xff] }
 0x1b7   :  { %v714_v24 = vpop.f32.mrf.mxu2 }
 0x1b8   :  { %v774_v25 = vpack.c.bf16 %v770_v22, %v770_v22  ;;  %v715_v26 = vadd.f32 %v714_v24, %v702_v21  ;;  %v2468_v24 = vld [vmem:[%s3576_s11 + $0x20] sm:$0xff] }
 0x1b9   :  { %v677_v29 = vpop.f32.mrf.mxu3  ;;  %v690_v30 = vpop.f32.mrf.mxu0 }
 0x1ba   :  { %v771_v31 = vmax.f32 %v715_v26, 0.0  ;;  %1176 = vmatmul.bf16.vlgmr.msra.gmra.mxu3 %v774_v25 }
 0x1bb   :  { %v753_v33 = vpop.f32.mrf.mxu1  ;;  %1408 = vmatpush.bf16.msra.mxu3 %v2455_v36 }
 0x1bc   :  { %v775_v34 = vpack.c.bf16 %v771_v31, %v771_v31  ;;  %v754_v44 = vadd.f32 %v753_v33, %v341_v40  ;;  %v2467_v40 = vld [vmem:[%s3576_s11 + $0x18] sm:$0xff] }
 0x1be   :  { %1189 = vmatmul.bf16.vlgmr.msrb.gmra.mxu0 %v775_v34 }
 0x1bf   :  { %v716_v37 = vpop.f32.mrf.mxu2  ;;  %1409 = vmatpush.bf16.msra.mxu3 %v2454_v54  ;;  %1421 = vmatpush.bf16.msrb.mxu0 %v2463_v58 }
 0x1c1   :  { %v727_v38 = vpop.f32.mrf.mxu3  ;;  %v740_v39 = vpop.f32.mrf.mxu0 }
 0x1c2   :  { %v728_v41 = vadd.f32 %v727_v38, %v340_v35 }
 0x1c3   :  { %v755_v42 = vpop.f32.mrf.mxu1  ;;  %1410 = vmatpush.bf16.msra.mxu3 %v2453_v55  ;;  %1422 = vmatpush.bf16.msrb.mxu0 %v2462_v60 }
 0x1c4   :  { %v741_v43 = vadd.f32 %v740_v39, %v728_v41  ;;  %v2466_v41 = vld [vmem:[%s3576_s11 + $0x10] sm:$0xff]  ;;  %v2465_v42 = vld [vmem:[%s3576_s11 + $0x8] sm:$0xff] }
 0x1c6   :  { %v772_v45 = vmax.f32 %v741_v43, 0.0  ;;  %v2464_v43 = vld [vmem:[%s3576_s11] sm:$0xff] }
 0x1c7   :  { %v766_v46 = vpop.f32.mrf.mxu2  ;;  %1411 = vmatpush.bf16.msra.mxu3 %v2452_v56  ;;  %1423 = vmatpush.bf16.msrb.mxu0 %v2461_v62  ;;  %v2472_v56 = vld [vmem:[%s3578_s13] sm:$0xff] }
 0x1c8   :  { %v776_v47 = vpack.c.bf16 %v772_v45, %v772_v45  ;;  %v767_v48 = vadd.f32 %v766_v46, %v754_v44  ;;  %v2475_v44 = vld [vmem:[%s3578_s13 + $0x18] sm:$0xff]  ;;  %v2474_v45 = vld [vmem:[%s3578_s13 + $0x10] sm:$0xff]  ;;  %v2473_v46 = vld [vmem:[%s3578_s13 + $0x8] sm:$0xff] }
 0x1c9   :  { %v729_v49 = vpop.f32.mrf.mxu3  ;;  %v742_v50 = vpop.f32.mrf.mxu0 }
 0x1ca   :  { %v773_v51 = vmax.f32 %v767_v48, 0.0  ;;  %1202 = vmatmul.bf16.vlgmr.msrb.gmra.mxu1 %v776_v47  ;;  %1228 = vmatmul.bf16.vlgmr.msrb.gmra.mxu3 %v774_v25  ;;  %v2477_v48 = vld [vmem:[%s3574_s10] ss:$0 sm:$0xff] }
 0x1cb   :  { %1412 = vmatpush.bf16.msra.mxu3 %v2451_v57  ;;  %1424 = vmatpush.bf16.msrb.mxu0 %v2460_v0  ;;  %v2478_v57 = vld [vmem:[%s3577_s12] ss:$0 sm:$0xff] }
 0x1cc   :  { %v777_v52 = vpack.c.bf16 %v773_v51, %v773_v51  ;;  %1504 = vmatpush.bf16.msrb.mxu1 %v2471_v12 }
 0x1ce   :  { %1215 = vmatmul.bf16.vlgmr.msrb.gmra.mxu2 %v777_v52  ;;  %1241 = vmatmul.bf16.vlgmr.msra.gmra.mxu0 %v775_v34 }
 0x1cf   :  { %v768_v53 = vpop.f32.mrf.mxu2  ;;  %1413 = vmatpush.bf16.msra.mxu3 %v2450_v59  ;;  %1425 = vmatpush.bf16.msrb.mxu0 %v2459_v1 }
 0x1d0   :  { %1505 = vmatpush.bf16.msrb.mxu1 %v2470_v15  ;;  %1563 = vmatpush.bf16.msrb.mxu2 %v2475_v44 }
 0x1d3   :  { %1414 = vmatpush.bf16.msra.mxu3 %v2449_v61  ;;  %1426 = vmatpush.bf16.msrb.mxu0 %v2458_v2 }
 0x1d4   :  { %1506 = vmatpush.bf16.msrb.mxu1 %v2469_v19  ;;  %1564 = vmatpush.bf16.msrb.mxu2 %v2474_v45 }
 0x1d7   :  { %1415 = vmatpush.bf16.msra.mxu3 %v2448_v63  ;;  %1427 = vmatpush.bf16.msrb.mxu0 %v2457_v5  ;;  %v2479_v63 = vld [vmem:[%s3579_s14] ss:$0 sm:$0xff] }
 0x1d8   :  { %1507 = vmatpush.bf16.msrb.mxu1 %v2468_v24  ;;  %1565 = vmatpush.bf16.msrb.mxu2 %v2473_v46 }
 0x1da   :  { %1254 = vmatmul.bf16.vlgmr.msra.gmra.mxu1 %v776_v47 }
 0x1db   :  { %1428 = vmatpush.bf16.msrb.mxu0 %v2456_v8 }
 0x1dc   :  { %1508 = vmatpush.bf16.msrb.mxu1 %v2467_v40  ;;  %1566 = vmatpush.bf16.msrb.mxu2 %v2472_v56 }
 0x1de   :  { %1267 = vmatmul.bf16.vlgmr.msra.gmra.mxu2 %v777_v52 }
 0x1e0   :  { %1509 = vmatpush.bf16.msrb.mxu1 %v2466_v41 }
 0x1e4   :  { %1510 = vmatpush.bf16.msrb.mxu1 %v2465_v42 }
 0x1e8   :  { %1511 = vmatpush.bf16.msrb.mxu1 %v2464_v43 }
 0x23b   :  { %v1190_v3 = vpop.f32.mrf.mxu0 }
 0x23d   :  { %v1177_v4 = vpop.f32.mrf.mxu3 }
 0x23e   :  { %v1178_v13 = vadd.f32 %v1177_v4, %v844_v10 }
 0x240   :  { %v1191_v17 = vadd.f32 %v1190_v3, %v1178_v13 }
 0x243   :  { %v1192_v7 = vpop.f32.mrf.mxu0 }
 0x245   :  { %v1179_v9 = vpop.f32.mrf.mxu3 }
 0x247   :  { %v1203_v11 = vpop.f32.mrf.mxu1 }
 0x248   :  { %v1204_v20 = vadd.f32 %v1203_v11, %v1191_v17 }
 0x24b   :  { %v1242_v14 = vpop.f32.mrf.mxu0 }
 0x24d   :  { %v1229_v16 = vpop.f32.mrf.mxu3 }
 0x24e   :  { %v1230_v31 = vadd.f32 %v1229_v16, %v845_v27 }
 0x24f   :  { %v1205_v18 = vpop.f32.mrf.mxu1 }
 0x250   :  { %v1243_v32 = vadd.f32 %v1242_v14, %v1230_v31 }
 0x251   :  { %v1216_v21 = vpop.f32.mrf.mxu2 }
 0x252   :  { %v1217_v22 = vadd.f32 %v1216_v21, %v1204_v20 }
 0x253   :  { %v1244_v23 = vpop.f32.mrf.mxu0 }
 0x254   :  { %v1272_v25 = vmax.f32 %v1217_v22, 0.0 }
 0x255   :  { %v1231_v26 = vpop.f32.mrf.mxu3 }
 0x256   :  { %v1274_v28 = vpack.c.bf16 %v1272_v25, %v1272_v25 }
 0x257   :  { %v1255_v29 = vpop.f32.mrf.mxu1 }
 0x258   :  { %1416 = vmatmul.bf16.vlgmr.msra.gmra.mxu3 %v1274_v28  ;;  %v1256_v34 = vadd.f32 %v1255_v29, %v1243_v32 }
 0x259   :  { %v1218_v30 = vpop.f32.mrf.mxu2 }
 0x25f   :  { %v1257_v33 = vpop.f32.mrf.mxu1 }
 0x261   :  { %v1268_v35 = vpop.f32.mrf.mxu2 }
 0x262   :  { %v1269_v36 = vadd.f32 %v1268_v35, %v1256_v34 }
 0x264   :  { %v1273_v37 = vmax.f32 %v1269_v36, 0.0 }
 0x266   :  { %v1275_v38 = vpack.c.bf16 %v1273_v37, %v1273_v37 }
 0x268   :  { %1429 = vmatmul.bf16.vlgmr.msrb.gmra.mxu0 %v1275_v38 }
 0x269   :  { %v1270_v39 = vpop.f32.mrf.mxu2 }
 0x2db   :  { %v1417_v47 = vpop.f32.mrf.mxu3 }
 0x2dc   :  { %v1418_v50 = vadd.f32 %v2477_v48, %v1417_v47 }
 0x2e3   :  { %v1419_v49 = vpop.f32.mrf.mxu3 }
 0x2e5   :  { %v1430_v51 = vpop.f32.mrf.mxu0 }
 0x2e6   :  { %v1431_v52 = vadd.f32 %v1430_v51, %v1418_v50 }
 0x2e8   :  { %v1434_v53 = vmax.f32 %v1431_v52, 0.0 }
 0x2ea   :  { %v1435_v54 = vpack.c.bf16 %v1434_v53, %v1434_v53 }
 0x2ec   :  { %1512 = vmatmul.bf16.vlgmr.msrb.gmra.mxu1 %v1435_v54 }
 0x2ed   :  { %v1432_v55 = vpop.f32.mrf.mxu0 }
 0x369   :  { %v1513_v58 = vpop.f32.mrf.mxu1 }
 0x36a   :  { %v1514_v59 = vadd.f32 %v2478_v57, %v1513_v58 }
 0x36c   :  { %v1517_v60 = vmax.f32 %v1514_v59, 0.0 }
 0x36e   :  { %v1518_v61 = vpack.c.bf16 %v1517_v60, %v1517_v60 }
 0x370   :  { %2296 = vmatmul.msk.bf16.vlgmr.msrb.gmra.mxu2 %vm1555_vm2, %v1518_v61 }
 0x371   :  { %v1515_v62 = vpop.f32.mrf.mxu1 }
 0x3f3   :  { %v1568_v0 = vpop.f32.mrf.mxu2 }
 0x3f4   :  { %v1569_v1 = vadd.f32 %v2479_v63, %v1568_v0 }
 0x3f6   :  { %v1572_v2 = vmax.f32 %v1569_v1, 0.0 }
 0x3f8   :  { %1574 = vst.msk [vmem:[%s3580_s15] sm:$0xff] %vm1573_vm3, %v1572_v2 }
 0x3fb   :  { %v1570_v3 = vpop.f32.mrf.mxu2 }

</bundles_post_ra>
